<compile_context>
chip_gen: v7x
topology: tpu7x:2x2x1
jax: 0.10.0
libtpu: 0.0.40
codegen_flags: <defaults>
</compile_context>

<pallas_src>
import math

import numpy as np

import jax
import jax.numpy as jnp
from jax.experimental import pallas as pl
from jax.experimental.pallas import tpu as pltpu

# ----------------------------- "args" ---------------------------------------
FIRST_SIZE = 64                       # args.first_size
N_HIDDEN = 32                         # args.n_hidden
SHAPE_LSTM = 8                        # args.shape_lstm  (non-zero branch)
FEAT_LSTM = FIRST_SIZE // SHAPE_LSTM  # = 8
assert FEAT_LSTM == SHAPE_LSTM, "fused 4-direction recurrence assumes equal T"

H = N_HIDDEN          # 32  hidden per direction
G = 4 * H             # 128 lanes per gate type (4 directions x 32)
NG = 4 * G            # 512 gate lanes per recurrence step (i|f|g|o)
T = SHAPE_LSTM        # 8   recurrence steps (same for lr and ud since 8==8)


# ----------------------------- fused Pallas kernel ---------------------------
def net_lstm_kernel(x_ref, fc1_w_ref, fc1_b_ref, wih_ref, whh_ref, b_ref,
                    fc3_w_ref, fc3_b_ref, out_ref):
    B = x_ref.shape[0]

    # --- fc1 + ReLU (bf16 MXU matmul, f32 accumulate / elementwise) ---
    h1 = jnp.dot(x_ref[...].astype(jnp.bfloat16), fc1_w_ref[...],
                 preferred_element_type=jnp.float32)
    h1 = jnp.maximum(h1 + fc1_b_ref[...], 0.0)                      # (B, 64)

    # --- hoisted input projection for all 4 directions and all T steps ---
    # wih_big already encodes view(B,8,8), permute(1,0,2)/permute(2,0,1),
    # the reverse-direction time flips and the per-direction W_ih, so
    # gx[:, t*NG:(t+1)*NG] is the x-part of the gates at recurrence step t
    # in [i|f|g|o] x [lr_f|lr_r|ud_f|ud_r] lane order.
    gx = jnp.dot(h1.astype(jnp.bfloat16), wih_ref[...],
                 preferred_element_type=jnp.float32)                # (B, T*NG)

    bias = b_ref[...]                                               # (1, NG) f32
    h = jnp.zeros((B, G), jnp.float32)      # lanes: [lr_f | lr_r | ud_f | ud_r]
    c = jnp.zeros((B, G), jnp.float32)

    for t in range(T):   # static trip count -> fully unrolled, static slices
        gates = (gx[:, t * NG:(t + 1) * NG] + bias
                 + jnp.dot(h.astype(jnp.bfloat16), whh_ref[...],
                           preferred_element_type=jnp.float32))     # (B, NG)
        # vreg-aligned 128-lane gate slices (PyTorch gate order i, f, g, o)
        i_g = jax.nn.sigmoid(gates[:, 0 * G:1 * G])
        f_g = jax.nn.sigmoid(gates[:, 1 * G:2 * G])
        g_g = jnp.tanh(gates[:, 2 * G:3 * G])
        o_g = jax.nn.sigmoid(gates[:, 3 * G:4 * G])
        c = f_g * c + i_g * g_g
        h = o_g * jnp.tanh(c)

    # h == torch.cat((h_lr[0], h_lr[1], h_ud[0], h_ud[1]), 1)  (dropout==0)
    logits = (jnp.dot(h.astype(jnp.bfloat16), fc3_w_ref[...],
                      preferred_element_type=jnp.float32) + fc3_b_ref[...])
    s = logits - jnp.max(logits, axis=-1, keepdims=True)
    out_ref[...] = s - jnp.log(jnp.sum(jnp.exp(s), axis=-1, keepdims=True))


# ----------------------------- forward wrapper --------------------------------
@jax.jit
def net_lstm_forward(params, x):
    B = x.shape[0]
    xf = x.reshape(B, -1).astype(jnp.float32)                       # (B, 784)
    return pl.pallas_call(
        net_lstm_kernel,
        out_shape=jax.ShapeDtypeStruct((B, 10), jnp.float32),
        # whole problem fits in VMEM on every generation -> no grid, full blocks
        in_specs=[pl.BlockSpec(memory_space=pltpu.MemorySpace.VMEM)] * 8,
        out_specs=pl.BlockSpec(memory_space=pltpu.MemorySpace.VMEM),
    )(xf, params["fc1_w"], params["fc1_b"], params["wih_big"],
      params["whh_bd"], params["lstm_b"], params["fc3_w"], params["fc3_b"])


# ----------------------------- parameter packing ------------------------------
def _uniform(key, shape, fan):
    bound = 1.0 / math.sqrt(fan)
    return jax.random.uniform(key, shape, jnp.float32, -bound, bound)


def _pack_lstm(lstm_dirs):
    """Pack 4 PyTorch-layout LSTM directions into the fused kernel layouts.

    lstm_dirs: list of (W_ih (4H,I), W_hh (4H,H), b_ih+b_hh (4H,)) in the order
               [lr_fwd, lr_rev, ud_fwd, ud_rev].
    Returns:
      wih_big (64, T*512): hoisted input projection (reshape/permute/flip fused)
      whh_bd  (128, 512) : block-diagonal recurrent weight
      bias    (1, 512)   : combined gate bias
    Column layout: col = gate_type*128 + dir*32 + k  (gate order i, f, g, o).
    """
    wih_big = np.zeros((FIRST_SIZE, T * NG), np.float32)
    whh_bd = np.zeros((G, NG), np.float32)
    bias = np.zeros((1, NG), np.float32)
    kinds = [("lr", False), ("lr", True), ("ud", False), ("ud", True)]

    for d, ((wih, whh, b), (kind, rev)) in enumerate(zip(lstm_dirs, kinds)):
        for gt in range(4):
            cols = slice(gt * G + d * H, gt * G + (d + 1) * H)
            bias[0, cols] = b[gt * H:(gt + 1) * H]
            whh_bd[d * H:(d + 1) * H, cols] = whh[gt * H:(gt + 1) * H, :].T
            w_t = wih[gt * H:(gt + 1) * H, :].T          # (input_size, H)
            for t in range(T):
                src = (T - 1 - t) if rev else t          # time-flip for reverse
                ccols = slice(t * NG + gt * G + d * H,
                              t * NG + gt * G + (d + 1) * H)
                if kind == "lr":
                    # x_lr[t=src] = x2[:, src, :] = h1[:, src*F : (src+1)*F]
                    wih_big[src * FEAT_LSTM:(src + 1) * FEAT_LSTM, ccols] = w_t
                else:
                    # x_ud[t=src] = x2[:, :, src] = h1[:, src::F]
                    wih_big[src::FEAT_LSTM, ccols] = w_t
    return wih_big, whh_bd, bias


def init_params(key):
    ks = jax.random.split(key, 5)
    fc1_w = _uniform(ks[0], (784, FIRST_SIZE), 784)          # (in, out)
    fc1_b = _uniform(ks[1], (1, FIRST_SIZE), 784)
    fc3_w = _uniform(ks[2], (4 * N_HIDDEN, 10), 4 * N_HIDDEN)
    fc3_b = _uniform(ks[3], (1, 10), 4 * N_HIDDEN)

    dir_keys = jax.random.split(ks[4], 4)
    in_sizes = (FEAT_LSTM, FEAT_LSTM, SHAPE_LSTM, SHAPE_LSTM)  # lr_f, lr_r, ud_f, ud_r
    lstm_dirs = []
    for dk, in_sz in zip(dir_keys, in_sizes):
        sub = jax.random.split(dk, 4)
        wih = np.asarray(_uniform(sub[0], (4 * N_HIDDEN, in_sz), N_HIDDEN))
        whh = np.asarray(_uniform(sub[1], (4 * N_HIDDEN, N_HIDDEN), N_HIDDEN))
        b = np.asarray(_uniform(sub[2], (4 * N_HIDDEN,), N_HIDDEN)
                       + _uniform(sub[3], (4 * N_HIDDEN,), N_HIDDEN))
        lstm_dirs.append((wih, whh, b))

    wih_big, whh_bd, lstm_b = _pack_lstm(lstm_dirs)

    params = {
        "fc1_w": fc1_w.astype(jnp.bfloat16),
        "fc1_b": fc1_b,
        "wih_big": jnp.asarray(wih_big, jnp.bfloat16),
        "whh_bd": jnp.asarray(whh_bd, jnp.bfloat16),
        "lstm_b": jnp.asarray(lstm_b, jnp.float32),
        "fc3_w": fc3_w.astype(jnp.bfloat16),
        "fc3_b": fc3_b,
    }
    raw = {"fc1_w": fc1_w, "fc1_b": fc1_b, "fc3_w": fc3_w, "fc3_b": fc3_b,
           "lstm_dirs": lstm_dirs}
    return params, raw


# ----------------------------- pure-JAX reference -----------------------------
def _mm(a, w):
    # mirror the kernel's precision: bf16 operands, f32 accumulation
    return jnp.dot(a.astype(jnp.bfloat16), jnp.asarray(w).astype(jnp.bfloat16),
                   preferred_element_type=jnp.float32)


def _reference_forward(raw, x):
    """Structure follows the PyTorch module directly (for validation)."""
    B = x.shape[0]
    xf = x.reshape(B, -1).astype(jnp.float32)
    h1 = jnp.maximum(_mm(xf, raw["fc1_w"]) + raw["fc1_b"], 0.0)
    x2 = h1.reshape(B, SHAPE_LSTM, FEAT_LSTM)
    seq_lr = jnp.transpose(x2, (1, 0, 2))   # permute(1,0,2)
    seq_ud = jnp.transpose(x2, (2, 0, 1))   # permute(2,0,1)

    def run_dir(seq, wih, whh, b):
        h = jnp.zeros((B, H), jnp.float32)
        c = jnp.zeros((B, H), jnp.float32)
        for t in range(seq.shape[0]):
            g = _mm(seq[t], wih.T) + _mm(h, whh.T) + jnp.asarray(b)[None, :]
            i = jax.nn.sigmoid(g[:, 0:H]); f = jax.nn.sigmoid(g[:, H:2 * H])
            gg = jnp.tanh(g[:, 2 * H:3 * H]); o = jax.nn.sigmoid(g[:, 3 * H:])
            c = f * c + i * gg
            h = o * jnp.tanh(c)
        return h

    seqs = [seq_lr, seq_lr[::-1], seq_ud, seq_ud[::-1]]
    hs = [run_dir(s, w, u, b) for s, (w, u, b) in zip(seqs, raw["lstm_dirs"])]
    feat = jnp.concatenate(hs, axis=1)                     # (B, 128)
    logits = _mm(feat, raw["fc3_w"]) + raw["fc3_b"]
    return jax.nn.log_softmax(logits, axis=-1)


# ----------------------------- main -------------------------------------------
if __name__ == "__main__":
    key = jax.random.PRNGKey(0)
    pkey, xkey = jax.random.split(key)
    params, raw = init_params(pkey)
    x = jax.random.normal(xkey, (2, 1, 28, 28), jnp.float32)   # NCHW, B=2

    out = net_lstm_forward(params, x)
    jax.block_until_ready(out)

    assert out.shape == (2, 10)
    # log_softmax rows must exponentiate-sum to 1
    assert jnp.allclose(jnp.sum(jnp.exp(out), axis=1), 1.0, atol=1e-4)
    # fused/packed kernel must match the straightforward reference
    ref = _reference_forward(raw, x)
    assert jnp.allclose(out, ref, atol=5e-3), float(jnp.max(jnp.abs(out - ref)))

    print("KERNEL_OK")
</pallas_src>

<mosaic_0001>
module attributes {stable_mosaic.version = 11 : i64} {
  func.func @net_lstm_kernel(%arg0: memref<2x784xf32, #tpu.memory_space<vmem>>, %arg1: memref<784x64xbf16, #tpu.memory_space<vmem>>, %arg2: memref<1x64xf32, #tpu.memory_space<vmem>>, %arg3: memref<64x4096xbf16, #tpu.memory_space<vmem>>, %arg4: memref<128x512xbf16, #tpu.memory_space<vmem>>, %arg5: memref<1x512xf32, #tpu.memory_space<vmem>>, %arg6: memref<128x10xbf16, #tpu.memory_space<vmem>>, %arg7: memref<1x10xf32, #tpu.memory_space<vmem>>, %arg8: memref<2x10xf32, #tpu.memory_space<vmem>>) attributes {dimension_semantics = [], scalar_prefetch = 0 : i64, scratch_operands = 0 : i64, tpu.core_type = #tpu.core_type<tc>} {
    %c0 = arith.constant 0 : index
    %c0_0 = arith.constant 0 : index
    %0 = vector.load %arg0[%c0, %c0_0] : memref<2x784xf32, #tpu.memory_space<vmem>>, vector<2x784xf32>
    %1 = arith.truncf %0 : vector<2x784xf32> to vector<2x784xbf16>
    %c0_1 = arith.constant 0 : index
    %c0_2 = arith.constant 0 : index
    %2 = vector.load %arg1[%c0_1, %c0_2] : memref<784x64xbf16, #tpu.memory_space<vmem>>, vector<784x64xbf16>
    %cst = arith.constant dense<0.000000e+00> : vector<2x64xf32>
    %3 = tpu.matmul %1, %2, %cst {dimension_numbers = #tpu.dot_dimension_numbers<[1], [0], [0], [1], [0, 0, 1, 1], [], []>} : vector<2x784xbf16>, vector<784x64xbf16>, vector<2x64xf32> -> vector<2x64xf32>
    %c0_3 = arith.constant 0 : index
    %c0_4 = arith.constant 0 : index
    %4 = vector.load %arg2[%c0_3, %c0_4] : memref<1x64xf32, #tpu.memory_space<vmem>>, vector<1x64xf32>
    %5 = vector.broadcast %4 : vector<1x64xf32> to vector<2x64xf32>
    %6 = arith.addf %3, %5 : vector<2x64xf32>
    %cst_5 = arith.constant 0.000000e+00 : f32
    %7 = vector.broadcast %cst_5 : f32 to vector<2x64xf32>
    %8 = arith.maximumf %6, %7 : vector<2x64xf32>
    %9 = arith.truncf %8 : vector<2x64xf32> to vector<2x64xbf16>
    %c0_6 = arith.constant 0 : index
    %c0_7 = arith.constant 0 : index
    %10 = vector.load %arg3[%c0_6, %c0_7] : memref<64x4096xbf16, #tpu.memory_space<vmem>>, vector<64x4096xbf16>
    %cst_8 = arith.constant dense<0.000000e+00> : vector<2x4096xf32>
    %11 = tpu.matmul %9, %10, %cst_8 {dimension_numbers = #tpu.dot_dimension_numbers<[1], [0], [0], [1], [0, 0, 1, 1], [], []>} : vector<2x64xbf16>, vector<64x4096xbf16>, vector<2x4096xf32> -> vector<2x4096xf32>
    %c0_9 = arith.constant 0 : index
    %c0_10 = arith.constant 0 : index
    %12 = vector.load %arg5[%c0_9, %c0_10] : memref<1x512xf32, #tpu.memory_space<vmem>>, vector<1x512xf32>
    %cst_11 = arith.constant 0.000000e+00 : f32
    %13 = vector.broadcast %cst_11 : f32 to vector<2x128xf32>
    %cst_12 = arith.constant 0.000000e+00 : f32
    %14 = vector.broadcast %cst_12 : f32 to vector<2x128xf32>
    %15 = vector.extract_strided_slice %11 {offsets = [0, 0], sizes = [2, 512], strides = [1, 1]} : vector<2x4096xf32> to vector<2x512xf32>
    %16 = vector.broadcast %12 : vector<1x512xf32> to vector<2x512xf32>
    %17 = arith.addf %15, %16 : vector<2x512xf32>
    %18 = arith.truncf %13 : vector<2x128xf32> to vector<2x128xbf16>
    %c0_13 = arith.constant 0 : index
    %c0_14 = arith.constant 0 : index
    %19 = vector.load %arg4[%c0_13, %c0_14] : memref<128x512xbf16, #tpu.memory_space<vmem>>, vector<128x512xbf16>
    %cst_15 = arith.constant dense<0.000000e+00> : vector<2x512xf32>
    %20 = tpu.matmul %18, %19, %cst_15 {dimension_numbers = #tpu.dot_dimension_numbers<[1], [0], [0], [1], [0, 0, 1, 1], [], []>} : vector<2x128xbf16>, vector<128x512xbf16>, vector<2x512xf32> -> vector<2x512xf32>
    %21 = arith.addf %17, %20 : vector<2x512xf32>
    %22 = vector.extract_strided_slice %21 {offsets = [0, 0], sizes = [2, 128], strides = [1, 1]} : vector<2x512xf32> to vector<2x128xf32>
    %23 = arith.negf %22 : vector<2x128xf32>
    %24 = math.exp %23 : vector<2x128xf32>
    %cst_16 = arith.constant 1.000000e+00 : f32
    %25 = vector.broadcast %cst_16 : f32 to vector<2x128xf32>
    %26 = arith.addf %25, %24 : vector<2x128xf32>
    %27 = arith.divf %25, %26 : vector<2x128xf32>
    %28 = vector.extract_strided_slice %21 {offsets = [0, 128], sizes = [2, 128], strides = [1, 1]} : vector<2x512xf32> to vector<2x128xf32>
    %29 = arith.negf %28 : vector<2x128xf32>
    %30 = math.exp %29 : vector<2x128xf32>
    %cst_17 = arith.constant 1.000000e+00 : f32
    %31 = vector.broadcast %cst_17 : f32 to vector<2x128xf32>
    %32 = arith.addf %31, %30 : vector<2x128xf32>
    %33 = arith.divf %31, %32 : vector<2x128xf32>
    %34 = vector.extract_strided_slice %21 {offsets = [0, 256], sizes = [2, 128], strides = [1, 1]} : vector<2x512xf32> to vector<2x128xf32>
    %35 = math.tanh %34 : vector<2x128xf32>
    %36 = vector.extract_strided_slice %21 {offsets = [0, 384], sizes = [2, 128], strides = [1, 1]} : vector<2x512xf32> to vector<2x128xf32>
    %37 = arith.negf %36 : vector<2x128xf32>
    %38 = math.exp %37 : vector<2x128xf32>
    %cst_18 = arith.constant 1.000000e+00 : f32
    %39 = vector.broadcast %cst_18 : f32 to vector<2x128xf32>
    %40 = arith.addf %39, %38 : vector<2x128xf32>
    %41 = arith.divf %39, %40 : vector<2x128xf32>
    %42 = arith.mulf %33, %14 : vector<2x128xf32>
    %43 = arith.mulf %27, %35 : vector<2x128xf32>
    %44 = arith.addf %42, %43 : vector<2x128xf32>
    %45 = math.tanh %44 : vector<2x128xf32>
    %46 = arith.mulf %41, %45 : vector<2x128xf32>
    %47 = vector.extract_strided_slice %11 {offsets = [0, 512], sizes = [2, 512], strides = [1, 1]} : vector<2x4096xf32> to vector<2x512xf32>
    %48 = vector.broadcast %12 : vector<1x512xf32> to vector<2x512xf32>
    %49 = arith.addf %47, %48 : vector<2x512xf32>
    %50 = arith.truncf %46 : vector<2x128xf32> to vector<2x128xbf16>
    %c0_19 = arith.constant 0 : index
    %c0_20 = arith.constant 0 : index
    %51 = vector.load %arg4[%c0_19, %c0_20] : memref<128x512xbf16, #tpu.memory_space<vmem>>, vector<128x512xbf16>
    %cst_21 = arith.constant dense<0.000000e+00> : vector<2x512xf32>
    %52 = tpu.matmul %50, %51, %cst_21 {dimension_numbers = #tpu.dot_dimension_numbers<[1], [0], [0], [1], [0, 0, 1, 1], [], []>} : vector<2x128xbf16>, vector<128x512xbf16>, vector<2x512xf32> -> vector<2x512xf32>
    %53 = arith.addf %49, %52 : vector<2x512xf32>
    %54 = vector.extract_strided_slice %53 {offsets = [0, 0], sizes = [2, 128], strides = [1, 1]} : vector<2x512xf32> to vector<2x128xf32>
    %55 = arith.negf %54 : vector<2x128xf32>
    %56 = math.exp %55 : vector<2x128xf32>
    %cst_22 = arith.constant 1.000000e+00 : f32
    %57 = vector.broadcast %cst_22 : f32 to vector<2x128xf32>
    %58 = arith.addf %57, %56 : vector<2x128xf32>
    %59 = arith.divf %57, %58 : vector<2x128xf32>
    %60 = vector.extract_strided_slice %53 {offsets = [0, 128], sizes = [2, 128], strides = [1, 1]} : vector<2x512xf32> to vector<2x128xf32>
    %61 = arith.negf %60 : vector<2x128xf32>
    %62 = math.exp %61 : vector<2x128xf32>
    %cst_23 = arith.constant 1.000000e+00 : f32
    %63 = vector.broadcast %cst_23 : f32 to vector<2x128xf32>
    %64 = arith.addf %63, %62 : vector<2x128xf32>
    %65 = arith.divf %63, %64 : vector<2x128xf32>
    %66 = vector.extract_strided_slice %53 {offsets = [0, 256], sizes = [2, 128], strides = [1, 1]} : vector<2x512xf32> to vector<2x128xf32>
    %67 = math.tanh %66 : vector<2x128xf32>
    %68 = vector.extract_strided_slice %53 {offsets = [0, 384], sizes = [2, 128], strides = [1, 1]} : vector<2x512xf32> to vector<2x128xf32>
    %69 = arith.negf %68 : vector<2x128xf32>
    %70 = math.exp %69 : vector<2x128xf32>
    %cst_24 = arith.constant 1.000000e+00 : f32
    %71 = vector.broadcast %cst_24 : f32 to vector<2x128xf32>
    %72 = arith.addf %71, %70 : vector<2x128xf32>
    %73 = arith.divf %71, %72 : vector<2x128xf32>
    %74 = arith.mulf %65, %44 : vector<2x128xf32>
    %75 = arith.mulf %59, %67 : vector<2x128xf32>
    %76 = arith.addf %74, %75 : vector<2x128xf32>
    %77 = math.tanh %76 : vector<2x128xf32>
    %78 = arith.mulf %73, %77 : vector<2x128xf32>
    %79 = vector.extract_strided_slice %11 {offsets = [0, 1024], sizes = [2, 512], strides = [1, 1]} : vector<2x4096xf32> to vector<2x512xf32>
    %80 = vector.broadcast %12 : vector<1x512xf32> to vector<2x512xf32>
    %81 = arith.addf %79, %80 : vector<2x512xf32>
    %82 = arith.truncf %78 : vector<2x128xf32> to vector<2x128xbf16>
    %c0_25 = arith.constant 0 : index
    %c0_26 = arith.constant 0 : index
    %83 = vector.load %arg4[%c0_25, %c0_26] : memref<128x512xbf16, #tpu.memory_space<vmem>>, vector<128x512xbf16>
    %cst_27 = arith.constant dense<0.000000e+00> : vector<2x512xf32>
    %84 = tpu.matmul %82, %83, %cst_27 {dimension_numbers = #tpu.dot_dimension_numbers<[1], [0], [0], [1], [0, 0, 1, 1], [], []>} : vector<2x128xbf16>, vector<128x512xbf16>, vector<2x512xf32> -> vector<2x512xf32>
    %85 = arith.addf %81, %84 : vector<2x512xf32>
    %86 = vector.extract_strided_slice %85 {offsets = [0, 0], sizes = [2, 128], strides = [1, 1]} : vector<2x512xf32> to vector<2x128xf32>
    %87 = arith.negf %86 : vector<2x128xf32>
    %88 = math.exp %87 : vector<2x128xf32>
    %cst_28 = arith.constant 1.000000e+00 : f32
    %89 = vector.broadcast %cst_28 : f32 to vector<2x128xf32>
    %90 = arith.addf %89, %88 : vector<2x128xf32>
    %91 = arith.divf %89, %90 : vector<2x128xf32>
    %92 = vector.extract_strided_slice %85 {offsets = [0, 128], sizes = [2, 128], strides = [1, 1]} : vector<2x512xf32> to vector<2x128xf32>
    %93 = arith.negf %92 : vector<2x128xf32>
    %94 = math.exp %93 : vector<2x128xf32>
    %cst_29 = arith.constant 1.000000e+00 : f32
    %95 = vector.broadcast %cst_29 : f32 to vector<2x128xf32>
    %96 = arith.addf %95, %94 : vector<2x128xf32>
    %97 = arith.divf %95, %96 : vector<2x128xf32>
    %98 = vector.extract_strided_slice %85 {offsets = [0, 256], sizes = [2, 128], strides = [1, 1]} : vector<2x512xf32> to vector<2x128xf32>
    %99 = math.tanh %98 : vector<2x128xf32>
    %100 = vector.extract_strided_slice %85 {offsets = [0, 384], sizes = [2, 128], strides = [1, 1]} : vector<2x512xf32> to vector<2x128xf32>
    %101 = arith.negf %100 : vector<2x128xf32>
    %102 = math.exp %101 : vector<2x128xf32>
    %cst_30 = arith.constant 1.000000e+00 : f32
    %103 = vector.broadcast %cst_30 : f32 to vector<2x128xf32>
    %104 = arith.addf %103, %102 : vector<2x128xf32>
    %105 = arith.divf %103, %104 : vector<2x128xf32>
    %106 = arith.mulf %97, %76 : vector<2x128xf32>
    %107 = arith.mulf %91, %99 : vector<2x128xf32>
    %108 = arith.addf %106, %107 : vector<2x128xf32>
    %109 = math.tanh %108 : vector<2x128xf32>
    %110 = arith.mulf %105, %109 : vector<2x128xf32>
    %111 = vector.extract_strided_slice %11 {offsets = [0, 1536], sizes = [2, 512], strides = [1, 1]} : vector<2x4096xf32> to vector<2x512xf32>
    %112 = vector.broadcast %12 : vector<1x512xf32> to vector<2x512xf32>
    %113 = arith.addf %111, %112 : vector<2x512xf32>
    %114 = arith.truncf %110 : vector<2x128xf32> to vector<2x128xbf16>
    %c0_31 = arith.constant 0 : index
    %c0_32 = arith.constant 0 : index
    %115 = vector.load %arg4[%c0_31, %c0_32] : memref<128x512xbf16, #tpu.memory_space<vmem>>, vector<128x512xbf16>
    %cst_33 = arith.constant dense<0.000000e+00> : vector<2x512xf32>
    %116 = tpu.matmul %114, %115, %cst_33 {dimension_numbers = #tpu.dot_dimension_numbers<[1], [0], [0], [1], [0, 0, 1, 1], [], []>} : vector<2x128xbf16>, vector<128x512xbf16>, vector<2x512xf32> -> vector<2x512xf32>
    %117 = arith.addf %113, %116 : vector<2x512xf32>
    %118 = vector.extract_strided_slice %117 {offsets = [0, 0], sizes = [2, 128], strides = [1, 1]} : vector<2x512xf32> to vector<2x128xf32>
    %119 = arith.negf %118 : vector<2x128xf32>
    %120 = math.exp %119 : vector<2x128xf32>
    %cst_34 = arith.constant 1.000000e+00 : f32
    %121 = vector.broadcast %cst_34 : f32 to vector<2x128xf32>
    %122 = arith.addf %121, %120 : vector<2x128xf32>
    %123 = arith.divf %121, %122 : vector<2x128xf32>
    %124 = vector.extract_strided_slice %117 {offsets = [0, 128], sizes = [2, 128], strides = [1, 1]} : vector<2x512xf32> to vector<2x128xf32>
    %125 = arith.negf %124 : vector<2x128xf32>
    %126 = math.exp %125 : vector<2x128xf32>
    %cst_35 = arith.constant 1.000000e+00 : f32
    %127 = vector.broadcast %cst_35 : f32 to vector<2x128xf32>
    %128 = arith.addf %127, %126 : vector<2x128xf32>
    %129 = arith.divf %127, %128 : vector<2x128xf32>
    %130 = vector.extract_strided_slice %117 {offsets = [0, 256], sizes = [2, 128], strides = [1, 1]} : vector<2x512xf32> to vector<2x128xf32>
    %131 = math.tanh %130 : vector<2x128xf32>
    %132 = vector.extract_strided_slice %117 {offsets = [0, 384], sizes = [2, 128], strides = [1, 1]} : vector<2x512xf32> to vector<2x128xf32>
    %133 = arith.negf %132 : vector<2x128xf32>
    %134 = math.exp %133 : vector<2x128xf32>
    %cst_36 = arith.constant 1.000000e+00 : f32
    %135 = vector.broadcast %cst_36 : f32 to vector<2x128xf32>
    %136 = arith.addf %135, %134 : vector<2x128xf32>
    %137 = arith.divf %135, %136 : vector<2x128xf32>
    %138 = arith.mulf %129, %108 : vector<2x128xf32>
    %139 = arith.mulf %123, %131 : vector<2x128xf32>
    %140 = arith.addf %138, %139 : vector<2x128xf32>
    %141 = math.tanh %140 : vector<2x128xf32>
    %142 = arith.mulf %137, %141 : vector<2x128xf32>
    %143 = vector.extract_strided_slice %11 {offsets = [0, 2048], sizes = [2, 512], strides = [1, 1]} : vector<2x4096xf32> to vector<2x512xf32>
    %144 = vector.broadcast %12 : vector<1x512xf32> to vector<2x512xf32>
    %145 = arith.addf %143, %144 : vector<2x512xf32>
    %146 = arith.truncf %142 : vector<2x128xf32> to vector<2x128xbf16>
    %c0_37 = arith.constant 0 : index
    %c0_38 = arith.constant 0 : index
    %147 = vector.load %arg4[%c0_37, %c0_38] : memref<128x512xbf16, #tpu.memory_space<vmem>>, vector<128x512xbf16>
    %cst_39 = arith.constant dense<0.000000e+00> : vector<2x512xf32>
    %148 = tpu.matmul %146, %147, %cst_39 {dimension_numbers = #tpu.dot_dimension_numbers<[1], [0], [0], [1], [0, 0, 1, 1], [], []>} : vector<2x128xbf16>, vector<128x512xbf16>, vector<2x512xf32> -> vector<2x512xf32>
    %149 = arith.addf %145, %148 : vector<2x512xf32>
    %150 = vector.extract_strided_slice %149 {offsets = [0, 0], sizes = [2, 128], strides = [1, 1]} : vector<2x512xf32> to vector<2x128xf32>
    %151 = arith.negf %150 : vector<2x128xf32>
    %152 = math.exp %151 : vector<2x128xf32>
    %cst_40 = arith.constant 1.000000e+00 : f32
    %153 = vector.broadcast %cst_40 : f32 to vector<2x128xf32>
    %154 = arith.addf %153, %152 : vector<2x128xf32>
    %155 = arith.divf %153, %154 : vector<2x128xf32>
    %156 = vector.extract_strided_slice %149 {offsets = [0, 128], sizes = [2, 128], strides = [1, 1]} : vector<2x512xf32> to vector<2x128xf32>
    %157 = arith.negf %156 : vector<2x128xf32>
    %158 = math.exp %157 : vector<2x128xf32>
    %cst_41 = arith.constant 1.000000e+00 : f32
    %159 = vector.broadcast %cst_41 : f32 to vector<2x128xf32>
    %160 = arith.addf %159, %158 : vector<2x128xf32>
    %161 = arith.divf %159, %160 : vector<2x128xf32>
    %162 = vector.extract_strided_slice %149 {offsets = [0, 256], sizes = [2, 128], strides = [1, 1]} : vector<2x512xf32> to vector<2x128xf32>
    %163 = math.tanh %162 : vector<2x128xf32>
    %164 = vector.extract_strided_slice %149 {offsets = [0, 384], sizes = [2, 128], strides = [1, 1]} : vector<2x512xf32> to vector<2x128xf32>
    %165 = arith.negf %164 : vector<2x128xf32>
    %166 = math.exp %165 : vector<2x128xf32>
    %cst_42 = arith.constant 1.000000e+00 : f32
    %167 = vector.broadcast %cst_42 : f32 to vector<2x128xf32>
    %168 = arith.addf %167, %166 : vector<2x128xf32>
    %169 = arith.divf %167, %168 : vector<2x128xf32>
    %170 = arith.mulf %161, %140 : vector<2x128xf32>
    %171 = arith.mulf %155, %163 : vector<2x128xf32>
    %172 = arith.addf %170, %171 : vector<2x128xf32>
    %173 = math.tanh %172 : vector<2x128xf32>
    %174 = arith.mulf %169, %173 : vector<2x128xf32>
    %175 = vector.extract_strided_slice %11 {offsets = [0, 2560], sizes = [2, 512], strides = [1, 1]} : vector<2x4096xf32> to vector<2x512xf32>
    %176 = vector.broadcast %12 : vector<1x512xf32> to vector<2x512xf32>
    %177 = arith.addf %175, %176 : vector<2x512xf32>
    %178 = arith.truncf %174 : vector<2x128xf32> to vector<2x128xbf16>
    %c0_43 = arith.constant 0 : index
    %c0_44 = arith.constant 0 : index
    %179 = vector.load %arg4[%c0_43, %c0_44] : memref<128x512xbf16, #tpu.memory_space<vmem>>, vector<128x512xbf16>
    %cst_45 = arith.constant dense<0.000000e+00> : vector<2x512xf32>
    %180 = tpu.matmul %178, %179, %cst_45 {dimension_numbers = #tpu.dot_dimension_numbers<[1], [0], [0], [1], [0, 0, 1, 1], [], []>} : vector<2x128xbf16>, vector<128x512xbf16>, vector<2x512xf32> -> vector<2x512xf32>
    %181 = arith.addf %177, %180 : vector<2x512xf32>
    %182 = vector.extract_strided_slice %181 {offsets = [0, 0], sizes = [2, 128], strides = [1, 1]} : vector<2x512xf32> to vector<2x128xf32>
    %183 = arith.negf %182 : vector<2x128xf32>
    %184 = math.exp %183 : vector<2x128xf32>
    %cst_46 = arith.constant 1.000000e+00 : f32
    %185 = vector.broadcast %cst_46 : f32 to vector<2x128xf32>
    %186 = arith.addf %185, %184 : vector<2x128xf32>
    %187 = arith.divf %185, %186 : vector<2x128xf32>
    %188 = vector.extract_strided_slice %181 {offsets = [0, 128], sizes = [2, 128], strides = [1, 1]} : vector<2x512xf32> to vector<2x128xf32>
    %189 = arith.negf %188 : vector<2x128xf32>
    %190 = math.exp %189 : vector<2x128xf32>
    %cst_47 = arith.constant 1.000000e+00 : f32
    %191 = vector.broadcast %cst_47 : f32 to vector<2x128xf32>
    %192 = arith.addf %191, %190 : vector<2x128xf32>
    %193 = arith.divf %191, %192 : vector<2x128xf32>
    %194 = vector.extract_strided_slice %181 {offsets = [0, 256], sizes = [2, 128], strides = [1, 1]} : vector<2x512xf32> to vector<2x128xf32>
    %195 = math.tanh %194 : vector<2x128xf32>
    %196 = vector.extract_strided_slice %181 {offsets = [0, 384], sizes = [2, 128], strides = [1, 1]} : vector<2x512xf32> to vector<2x128xf32>
    %197 = arith.negf %196 : vector<2x128xf32>
    %198 = math.exp %197 : vector<2x128xf32>
    %cst_48 = arith.constant 1.000000e+00 : f32
    %199 = vector.broadcast %cst_48 : f32 to vector<2x128xf32>
    %200 = arith.addf %199, %198 : vector<2x128xf32>
    %201 = arith.divf %199, %200 : vector<2x128xf32>
    %202 = arith.mulf %193, %172 : vector<2x128xf32>
    %203 = arith.mulf %187, %195 : vector<2x128xf32>
    %204 = arith.addf %202, %203 : vector<2x128xf32>
    %205 = math.tanh %204 : vector<2x128xf32>
    %206 = arith.mulf %201, %205 : vector<2x128xf32>
    %207 = vector.extract_strided_slice %11 {offsets = [0, 3072], sizes = [2, 512], strides = [1, 1]} : vector<2x4096xf32> to vector<2x512xf32>
    %208 = vector.broadcast %12 : vector<1x512xf32> to vector<2x512xf32>
    %209 = arith.addf %207, %208 : vector<2x512xf32>
    %210 = arith.truncf %206 : vector<2x128xf32> to vector<2x128xbf16>
    %c0_49 = arith.constant 0 : index
    %c0_50 = arith.constant 0 : index
    %211 = vector.load %arg4[%c0_49, %c0_50] : memref<128x512xbf16, #tpu.memory_space<vmem>>, vector<128x512xbf16>
    %cst_51 = arith.constant dense<0.000000e+00> : vector<2x512xf32>
    %212 = tpu.matmul %210, %211, %cst_51 {dimension_numbers = #tpu.dot_dimension_numbers<[1], [0], [0], [1], [0, 0, 1, 1], [], []>} : vector<2x128xbf16>, vector<128x512xbf16>, vector<2x512xf32> -> vector<2x512xf32>
    %213 = arith.addf %209, %212 : vector<2x512xf32>
    %214 = vector.extract_strided_slice %213 {offsets = [0, 0], sizes = [2, 128], strides = [1, 1]} : vector<2x512xf32> to vector<2x128xf32>
    %215 = arith.negf %214 : vector<2x128xf32>
    %216 = math.exp %215 : vector<2x128xf32>
    %cst_52 = arith.constant 1.000000e+00 : f32
    %217 = vector.broadcast %cst_52 : f32 to vector<2x128xf32>
    %218 = arith.addf %217, %216 : vector<2x128xf32>
    %219 = arith.divf %217, %218 : vector<2x128xf32>
    %220 = vector.extract_strided_slice %213 {offsets = [0, 128], sizes = [2, 128], strides = [1, 1]} : vector<2x512xf32> to vector<2x128xf32>
    %221 = arith.negf %220 : vector<2x128xf32>
    %222 = math.exp %221 : vector<2x128xf32>
    %cst_53 = arith.constant 1.000000e+00 : f32
    %223 = vector.broadcast %cst_53 : f32 to vector<2x128xf32>
    %224 = arith.addf %223, %222 : vector<2x128xf32>
    %225 = arith.divf %223, %224 : vector<2x128xf32>
    %226 = vector.extract_strided_slice %213 {offsets = [0, 256], sizes = [2, 128], strides = [1, 1]} : vector<2x512xf32> to vector<2x128xf32>
    %227 = math.tanh %226 : vector<2x128xf32>
    %228 = vector.extract_strided_slice %213 {offsets = [0, 384], sizes = [2, 128], strides = [1, 1]} : vector<2x512xf32> to vector<2x128xf32>
    %229 = arith.negf %228 : vector<2x128xf32>
    %230 = math.exp %229 : vector<2x128xf32>
    %cst_54 = arith.constant 1.000000e+00 : f32
    %231 = vector.broadcast %cst_54 : f32 to vector<2x128xf32>
    %232 = arith.addf %231, %230 : vector<2x128xf32>
    %233 = arith.divf %231, %232 : vector<2x128xf32>
    %234 = arith.mulf %225, %204 : vector<2x128xf32>
    %235 = arith.mulf %219, %227 : vector<2x128xf32>
    %236 = arith.addf %234, %235 : vector<2x128xf32>
    %237 = math.tanh %236 : vector<2x128xf32>
    %238 = arith.mulf %233, %237 : vector<2x128xf32>
    %239 = vector.extract_strided_slice %11 {offsets = [0, 3584], sizes = [2, 512], strides = [1, 1]} : vector<2x4096xf32> to vector<2x512xf32>
    %240 = vector.broadcast %12 : vector<1x512xf32> to vector<2x512xf32>
    %241 = arith.addf %239, %240 : vector<2x512xf32>
    %242 = arith.truncf %238 : vector<2x128xf32> to vector<2x128xbf16>
    %c0_55 = arith.constant 0 : index
    %c0_56 = arith.constant 0 : index
    %243 = vector.load %arg4[%c0_55, %c0_56] : memref<128x512xbf16, #tpu.memory_space<vmem>>, vector<128x512xbf16>
    %cst_57 = arith.constant dense<0.000000e+00> : vector<2x512xf32>
    %244 = tpu.matmul %242, %243, %cst_57 {dimension_numbers = #tpu.dot_dimension_numbers<[1], [0], [0], [1], [0, 0, 1, 1], [], []>} : vector<2x128xbf16>, vector<128x512xbf16>, vector<2x512xf32> -> vector<2x512xf32>
    %245 = arith.addf %241, %244 : vector<2x512xf32>
    %246 = vector.extract_strided_slice %245 {offsets = [0, 0], sizes = [2, 128], strides = [1, 1]} : vector<2x512xf32> to vector<2x128xf32>
    %247 = arith.negf %246 : vector<2x128xf32>
    %248 = math.exp %247 : vector<2x128xf32>
    %cst_58 = arith.constant 1.000000e+00 : f32
    %249 = vector.broadcast %cst_58 : f32 to vector<2x128xf32>
    %250 = arith.addf %249, %248 : vector<2x128xf32>
    %251 = arith.divf %249, %250 : vector<2x128xf32>
    %252 = vector.extract_strided_slice %245 {offsets = [0, 128], sizes = [2, 128], strides = [1, 1]} : vector<2x512xf32> to vector<2x128xf32>
    %253 = arith.negf %252 : vector<2x128xf32>
    %254 = math.exp %253 : vector<2x128xf32>
    %cst_59 = arith.constant 1.000000e+00 : f32
    %255 = vector.broadcast %cst_59 : f32 to vector<2x128xf32>
    %256 = arith.addf %255, %254 : vector<2x128xf32>
    %257 = arith.divf %255, %256 : vector<2x128xf32>
    %258 = vector.extract_strided_slice %245 {offsets = [0, 256], sizes = [2, 128], strides = [1, 1]} : vector<2x512xf32> to vector<2x128xf32>
    %259 = math.tanh %258 : vector<2x128xf32>
    %260 = vector.extract_strided_slice %245 {offsets = [0, 384], sizes = [2, 128], strides = [1, 1]} : vector<2x512xf32> to vector<2x128xf32>
    %261 = arith.negf %260 : vector<2x128xf32>
    %262 = math.exp %261 : vector<2x128xf32>
    %cst_60 = arith.constant 1.000000e+00 : f32
    %263 = vector.broadcast %cst_60 : f32 to vector<2x128xf32>
    %264 = arith.addf %263, %262 : vector<2x128xf32>
    %265 = arith.divf %263, %264 : vector<2x128xf32>
    %266 = arith.mulf %257, %236 : vector<2x128xf32>
    %267 = arith.mulf %251, %259 : vector<2x128xf32>
    %268 = arith.addf %266, %267 : vector<2x128xf32>
    %269 = math.tanh %268 : vector<2x128xf32>
    %270 = arith.mulf %265, %269 : vector<2x128xf32>
    %271 = arith.truncf %270 : vector<2x128xf32> to vector<2x128xbf16>
    %c0_61 = arith.constant 0 : index
    %c0_62 = arith.constant 0 : index
    %272 = vector.load %arg6[%c0_61, %c0_62] : memref<128x10xbf16, #tpu.memory_space<vmem>>, vector<128x10xbf16>
    %cst_63 = arith.constant dense<0.000000e+00> : vector<2x10xf32>
    %273 = tpu.matmul %271, %272, %cst_63 {dimension_numbers = #tpu.dot_dimension_numbers<[1], [0], [0], [1], [0, 0, 1, 1], [], []>} : vector<2x128xbf16>, vector<128x10xbf16>, vector<2x10xf32> -> vector<2x10xf32>
    %c0_64 = arith.constant 0 : index
    %c0_65 = arith.constant 0 : index
    %274 = vector.load %arg7[%c0_64, %c0_65] : memref<1x10xf32, #tpu.memory_space<vmem>>, vector<1x10xf32>
    %275 = vector.broadcast %274 : vector<1x10xf32> to vector<2x10xf32>
    %276 = arith.addf %273, %275 : vector<2x10xf32>
    %cst_66 = arith.constant dense<0xFF800000> : vector<2xf32>
    %277 = vector.multi_reduction <maximumf>, %276, %cst_66 [1] : vector<2x10xf32> to vector<2xf32>
    %278 = vector.shape_cast %277 : vector<2xf32> to vector<2x1xf32>
    %279 = vector.broadcast %278 : vector<2x1xf32> to vector<2x10xf32>
    %280 = arith.subf %276, %279 : vector<2x10xf32>
    %281 = math.exp %280 : vector<2x10xf32>
    %cst_67 = arith.constant dense<0.000000e+00> : vector<2xf32>
    %282 = vector.multi_reduction <add>, %281, %cst_67 [1] : vector<2x10xf32> to vector<2xf32>
    %283 = vector.shape_cast %282 : vector<2xf32> to vector<2x1xf32>
    %284 = math.log %283 : vector<2x1xf32>
    %285 = vector.broadcast %284 : vector<2x1xf32> to vector<2x10xf32>
    %286 = arith.subf %280, %285 : vector<2x10xf32>
    %c0_68 = arith.constant 0 : index
    %c0_69 = arith.constant 0 : index
    %287 = vector.load %arg8[%c0_68, %c0_69] : memref<2x10xf32, #tpu.memory_space<vmem>>, vector<2x10xf32>
    tpu.vector_store %arg8[%c0_68, %c0_69], %286 {strides = array<i32>} : memref<2x10xf32, #tpu.memory_space<vmem>>, vector<2x10xf32>,
    return
  }
}

</mosaic_0001>

<bundles_post_ra>
// kernel: net_lstm_forward.1
= control target key start
LH: loop header
LB: loop body
LE: loop exit
PB: predicated region body
PF: predicated region fallthrough
CT: control target
= control target key end

     0   :  { %13 = vsyncpa [#allocation3], 0  ;;  %s4998_s0 = inlined_call_operand.vmem [shape: f32[2,784], index: 0, kind: input, shape index: {}]   ;;  %s4999_s1 = inlined_call_operand.vmem [shape: bf16[784,64], index: 1, kind: input, shape index: {}]   ;;  %s5000_s2 = inlined_call_operand.vmem [shape: f32[1,64], index: 2, kind: input, shape index: {}]   ;;  %s5001_s3 = inlined_call_operand.hbm [shape: bf16[64,4096], index: 3, kind: input, shape index: {}]   ;;  %s5002_s4 = inlined_call_operand.vmem [shape: bf16[128,512], index: 4, kind: input, shape index: {}]   ;;  %s5003_s5 = inlined_call_operand.vmem [shape: f32[1,512], index: 5, kind: input, shape index: {}]   ;;  %s5004_s6 = inlined_call_operand.vmem [shape: bf16[128,10], index: 6, kind: input, shape index: {}]   ;;  %s5005_s7 = inlined_call_operand.vmem [shape: f32[1,10], index: 7, kind: input, shape index: {}]   ;;  %s5006_s8 = inlined_call_operand.hbm [shape: f32[2,10], index: 8, kind: output, shape index: {}]  }
   0x1   :  { %14 = vsyncpa [#allocation4], 0  ;;  %s4130_s27 = smov [#allocation2]   ;;  %s4082_s9 = scalar_lea.hbm %s5001_s3, 16384 }
   0x2   :  { %s26_s28 = sshll.u32 %s4130_s27, 4  ;;  %p4083_p0 = scmp.ne.s32.totalorder %s5001_s3, %s4082_s9  ;;  %s27_s28 = int_to_ptr.vmem [resolvable:$true] %s26_s28 }
   0x3   :  { %p4086_p1 = scmp.lt.u32.totalorder %s4082_s9, %s5001_s3 }
   0x5   :  { %p4088_p2 = pnand %p4086_p1, %p4083_p0 }
   0x7   :  { %4091 = shalt.err (!%p4088_p2)
}
   0x8   :  { %s4092_s14 = scalar_lea.vmem %s27_s28, 16384  ;;  %p4097_p4 = scmp.lt.s32.totalorder %s27_s28, %s27_s28 }
   0x9   :  { %p4093_p3 = scmp.ne.s32.totalorder %s27_s28, %s4092_s14  ;;  %p4098_p5 = scmp.lt.s32.totalorder %s4092_s14, %s4092_s14 }
   0xb   :  { %p4099_p6 = por %p4098_p5, %p4097_p4 }
   0xd   :  { %p4100_p7 = pnand %p4099_p6, %p4093_p3 }
   0xf   :  { %4103 = shalt.err (!%p4100_p7)
}
  0x10   :  { %s4131_s15 = smov 2048   ;;  %s4132_s16 = smov 128  }
  0x11   :  { %32 = dma.hbm_to_vmem [thread:$0]  %s5001_s3, 16384, %s27_s28, [#allocation3], %s4131_s15, %s4131_s15, %s4132_s16  }
  0x12   :  { %4126 = dma.done.wait [#allocation3], 16384  }
  0x13   :  { %4127 = vsyncadd [#allocation3], 4294950912  ;;  %v3828_v0 = vld [vmem:[%s4999_s1 + $0x40] sm:$0xff]   ;;  %v3832_v4 = vld [vmem:[%s4999_s1 + $0x48] sm:$0xff]   ;;  %v4133_v21 = vmov 1983009808   ;;  %v53_v23 = vlaneseq }
  0x14   :  { %v3829_v1 = vld [vmem:[%s4999_s1] sm:$0xff]   ;;  %3623 = vmatprep.subr.bf16.mxu0 %v3828_v0  ;;  %v3833_v5 = vld [vmem:[%s4999_s1 + $0x8] sm:$0xff]   ;;  %v3836_v8 = vld [vmem:[%s4999_s1 + $0x50] sm:$0xff]   ;;  %v51_v22 = vunpack.c.l.s4 %v4133_v21  ;;  %v4134_v45 = vmov 0.0   ;;  %vm4135_vm0 = vmmov 0   ;;  %vm495_vm1 = vcmask 130048  }
  0x15   :  { %v3830_v2 = vld [vmem:[%s4999_s1 + $0xc0] sm:$0xff]   ;;  %3624 = vmatpush3.bf16.msra.mxu0 %v3829_v1  ;;  %v3834_v6 = vld [vmem:[%s4999_s1 + $0xc8] sm:$0xff]   ;;  %v3837_v9 = vld [vmem:[%s4999_s1 + $0x10] sm:$0xff]   ;;  %v4270_v29 = vshrl.u32 %v53_v23, 7  ;;  %vm1429_vm2 = vcmask 523264   ;;  %vm3334_vm3 = vcmask 74752  }
  0x16   :  { %v3831_v3 = vld [vmem:[%s4999_s1 + $0x80] sm:$0xff]   ;;  %3645 = vmatprep.subr.bf16.mxu1 %v3830_v2  ;;  %3625 = vmatprep.subr.bf16.mxu0 %v3832_v4  ;;  %v3835_v7 = vld [vmem:[%s4999_s1 + $0x88] sm:$0xff]   ;;  %v3838_v10 = vld [vmem:[%s4999_s1 + $0xd0] sm:$0xff]   ;;  %v52_v28 = vunpack.c.0.s8 %v51_v22 }
  0x17   :  { %3646 = vmatpush3.bf16.msra.mxu1 %v3831_v3  ;;  %v3839_v11 = vld [vmem:[%s4999_s1 + $0x90] sm:$0xff]   ;;  %v3840_v12 = vld [vmem:[%s4999_s1 + $0x58] sm:$0xff]   ;;  %v3844_v16 = vld [vmem:[%s4999_s1 + $0x60] sm:$0xff]  }
  0x18   :  { %3647 = vmatprep.subr.bf16.mxu1 %v3834_v6  ;;  %v3841_v13 = vld [vmem:[%s4999_s1 + $0x18] sm:$0xff]   ;;  %v3845_v17 = vld [vmem:[%s4999_s1 + $0x20] sm:$0xff]   ;;  %v3848_v20 = vld [vmem:[%s4999_s1 + $0x68] sm:$0xff]   ;;  %v55_v34 = vsub.s32 %v52_v28, %v4270_v29 }
  0x19   :  { %3626 = vmatpush3.bf16.msra.mxu0 %v3833_v5  ;;  %v3842_v14 = vld [vmem:[%s4999_s1 + $0xd8] sm:$0xff]   ;;  %v3846_v18 = vld [vmem:[%s4999_s1 + $0xe0] sm:$0xff]   ;;  %v3849_v24 = vld [vmem:[%s4999_s1 + $0x28] sm:$0xff]  }
  0x1a   :  { %3627 = vmatprep.subr.bf16.mxu0 %v3836_v8  ;;  %v3843_v15 = vld [vmem:[%s4999_s1 + $0x98] sm:$0xff]   ;;  %v3847_v19 = vld [vmem:[%s4999_s1 + $0xa0] sm:$0xff]   ;;  %v3850_v25 = vld [vmem:[%s4999_s1 + $0xe8] sm:$0xff]  }
  0x1b   :  { %3648 = vmatpush3.bf16.msra.mxu1 %v3835_v7  ;;  %v3851_v26 = vld [vmem:[%s4999_s1 + $0xa8] sm:$0xff]   ;;  %v3852_v27 = vld [vmem:[%s4999_s1 + $0x70] sm:$0xff]   ;;  %v3856_v33 = vld [vmem:[%s4999_s1 + $0x78] sm:$0xff]  }
  0x1c   :  { %3649 = vmatprep.subr.bf16.mxu1 %v3838_v10  ;;  %v3853_v30 = vld [vmem:[%s4999_s1 + $0x30] sm:$0xff]   ;;  %v3857_v35 = vld [vmem:[%s4999_s1 + $0x38] sm:$0xff]   ;;  %v45_v37 = vld [vmem:[%s4998_s0] sm:$0xff] }
  0x1d   :  { %3628 = vmatpush3.bf16.msra.mxu0 %v3837_v9  ;;  %v3854_v31 = vld [vmem:[%s4999_s1 + $0xf0] sm:$0xff]   ;;  %v3858_v36 = vld [vmem:[%s4999_s1 + $0xf8] sm:$0xff]   ;;  %v56_v38 = vrot.slane %v45_v37, %v55_v34  ;;  %v49_v40 = vcombine.high %v45_v37, %v45_v37  ;;  %v3860_v41 = vld [vmem:[%s4999_s1 + $0x140] sm:$0xff]  }
  0x1e   :  { %3629 = vmatprep.subr.bf16.mxu0 %v3840_v12  ;;  %v3855_v32 = vld [vmem:[%s4999_s1 + $0xb0] sm:$0xff]   ;;  %v3859_v39 = vld [vmem:[%s4999_s1 + $0xb8] sm:$0xff]   ;;  %v3862_v48 = vld [vmem:[%s4999_s1 + $0x100] sm:$0xff]  }
  0x1f   :  { %3650 = vmatpush3.bf16.msra.mxu1 %v3839_v11  ;;  %v64_v42 = vcombine.high %v56_v38, %v56_v38  ;;  %v63_v43 = vrot.slane %v49_v40, %v55_v34  ;;  %v89_v44 = vpack.c.bf16 %v56_v38, %v56_v38  ;;  %v3863_v50 = vld [vmem:[%s4999_s1 + $0x148] sm:$0xff]   ;;  %v3865_v53 = vld [vmem:[%s4999_s1 + $0x150] sm:$0xff]   ;;  %v3867_v55 = vld [vmem:[%s4999_s1 + $0x158] sm:$0xff]  }
  0x20   :  { %3651 = vmatprep.subr.bf16.mxu1 %v3842_v14  ;;  %v3864_v52 = vld [vmem:[%s4999_s1 + $0x108] sm:$0xff]   ;;  %v3866_v54 = vld [vmem:[%s4999_s1 + $0x110] sm:$0xff]   ;;  %v3868_v56 = vld [vmem:[%s4999_s1 + $0x118] sm:$0xff]  }
  0x21   :  { %3630 = vmatpush3.bf16.msra.mxu0 %v3841_v13  ;;  %v90_v46 = vpack.c.bf16 %v64_v42, %v64_v42  ;;  %v65_v47 = vcombine.high %v63_v43, %v63_v43  ;;  %v91_v49 = vpack.c.bf16 %v63_v43, %v63_v43  ;;  %v3869_v57 = vld [vmem:[%s4999_s1 + $0x160] sm:$0xff]   ;;  %v46_v59 = vld [vmem:[%s4998_s0 + $0x8] sm:$0x3f]  ;;  %v3873_v5 = vld [vmem:[%s4999_s1 + $0x170] sm:$0xff]  }
  0x22   :  { %3631 = vmatprep.subr.bf16.mxu0 %v3844_v16  ;;  %v3877_v58 = vld [vmem:[%s4999_s1 + $0x180] sm:$0xff]   ;;  %v66_v61 = vcombine.high %v46_v59, %v46_v59  ;;  %v73_v62 = vrot.slane %v46_v59, %v55_v34  ;;  %v3871_v63 = vld [vmem:[%s4999_s1 + $0x168] sm:$0xff]   ;;  %v3874_v6 = vld [vmem:[%s4999_s1 + $0x130] sm:$0xff]  }
  0x23   :  { %3652 = vmatpush3.bf16.msra.mxu1 %v3843_v15  ;;  %531 = vmatprep.mubr.bf16.mxu0 %v90_v46  ;;  %v92_v51 = vpack.c.bf16 %v65_v47, %v65_v47  ;;  %v3870_v60 = vld [vmem:[%s4999_s1 + $0x120] sm:$0xff]   ;;  %v3872_v2 = vld [vmem:[%s4999_s1 + $0x128] sm:$0xff]   ;;  %v3875_v7 = vld [vmem:[%s4999_s1 + $0x178] sm:$0xff]  }
  0x24   :  { %3653 = vmatprep.subr.bf16.mxu1 %v3846_v18  ;;  %v80_v0 = vrot.slane %v66_v61, %v55_v34  ;;  %v81_v1 = vcombine.high %v73_v62, %v73_v62  ;;  %v3876_v8 = vld [vmem:[%s4999_s1 + $0x138] sm:$0xff]   ;;  %v93_v9 = vpack.c.bf16 %v73_v62, %v73_v62  ;;  %v661_v10 = vld [vmem:[#allocation2] sm:$0xff]  ;;  %v662_v12 = vld [vmem:[#allocation2 + $0x8] sm:$0xff] }
  0x25   :  { %3632 = vmatpush3.bf16.msra.mxu0 %v3845_v17  ;;  %571 = vmatprep.mubr.bf16.mxu1 %v92_v51  ;;  %v677_v11 = vld [vmem:[#allocation2 + $0x80] sm:$0xff]  ;;  %v678_v15 = vld [vmem:[#allocation2 + $0x88] sm:$0xff]  ;;  %v663_v43 = vld [vmem:[#allocation2 + $0x10] sm:$0xff] }
  0x26   :  { %3633 = vmatprep.subr.bf16.mxu0 %v3848_v20  ;;  %v94_v3 = vpack.c.bf16 %v81_v1, %v81_v1  ;;  %v95_v4 = vpack.c.bf16 %v80_v0, %v80_v0  ;;  %v3414_v13 = vcombine.low %v661_v10, %v677_v11  ;;  %v3415_v14 = vcombine.high %v661_v10, %v677_v11  ;;  %v693_v16 = vld [vmem:[#allocation2 + $0x100] sm:$0xff]  ;;  %v694_v21 = vld [vmem:[#allocation2 + $0x108] sm:$0xff]  ;;  %v664_v46 = vld [vmem:[#allocation2 + $0x18] sm:$0xff] }
  0x27   :  { %3654 = vmatpush3.bf16.msra.mxu1 %v3847_v19  ;;  %v709_v17 = vld [vmem:[#allocation2 + $0x180] sm:$0xff]  ;;  %v3416_v18 = vcombine.low %v662_v12, %v678_v15  ;;  %v3417_v19 = vcombine.high %v662_v12, %v678_v15  ;;  %v710_v22 = vld [vmem:[#allocation2 + $0x188] sm:$0xff]  ;;  %v696_v15 = vld [vmem:[#allocation2 + $0x118] sm:$0xff] }
  0x28   :  { %3655 = vmatprep.subr.bf16.mxu1 %v3850_v25  ;;  %v3447_v20 = vcombine.high %v693_v16, %v709_v17  ;;  %v3449_v23 = vcombine.high %v694_v21, %v710_v22  ;;  %v3448_v25 = vcombine.low %v694_v21, %v710_v22  ;;  %v726_v28 = vld [vmem:[#allocation2 + $0x208] sm:$0xff]  ;;  %v727_v21 = vld [vmem:[#allocation2 + $0x210] sm:$0xff] }
  0x29   :  { %3634 = vmatpush3.bf16.msra.mxu0 %v3849_v24  ;;  %v3446_v24 = vcombine.low %v693_v16, %v709_v17  ;;  %v758_v37 = vld [vmem:[#allocation2 + $0x308] sm:$0xff]  ;;  %v712_v16 = vld [vmem:[#allocation2 + $0x198] sm:$0xff]  ;;  %v743_v22 = vld [vmem:[#allocation2 + $0x290] sm:$0xff] }
  0x2a   :  { %3635 = vmatprep.subr.bf16.mxu0 %v3852_v27  ;;  %v741_v27 = vld [vmem:[#allocation2 + $0x280] sm:$0xff] }
  0x2b   :  { %3656 = vmatpush3.bf16.msra.mxu1 %v3851_v26  ;;  %v725_v26 = vld [vmem:[#allocation2 + $0x200] sm:$0xff] }
  0x2c   :  { %3657 = vmatprep.subr.bf16.mxu1 %v3854_v31  ;;  %v742_v31 = vld [vmem:[#allocation2 + $0x288] sm:$0xff] }
  0x2d   :  { %3636 = vmatpush3.bf16.msra.mxu0 %v3853_v30  ;;  %v3479_v30 = vcombine.high %v725_v26, %v741_v27  ;;  %v3481_v34 = vcombine.high %v726_v28, %v742_v31 }
  0x2e   :  { %3637 = vmatprep.subr.bf16.mxu0 %v3856_v33  ;;  %v3480_v33 = vcombine.low %v726_v28, %v742_v31  ;;  %v775_v31 = vld [vmem:[#allocation2 + $0x390] sm:$0xff] }
  0x2f   :  { %3658 = vmatpush3.bf16.msra.mxu1 %v3855_v32  ;;  %v3478_v32 = vcombine.low %v725_v26, %v741_v27  ;;  %v3452_v26 = vcombine.low %v696_v15, %v712_v16  ;;  %v3483_v27 = vcombine.high %v727_v21, %v743_v22 }
  0x30   :  { %3659 = vmatprep.subr.bf16.mxu1 %v3858_v36  ;;  %v773_v36 = vld [vmem:[#allocation2 + $0x380] sm:$0xff] }
  0x31   :  { %3638 = vmatpush3.bf16.msra.mxu0 %v3857_v35  ;;  %v757_v35 = vld [vmem:[#allocation2 + $0x300] sm:$0xff] }
  0x32   :  { %3667 = vmatprep.subr.bf16.mxu0 %v3860_v41  ;;  %v3511_v38 = vcombine.high %v757_v35, %v773_v36  ;;  %v3510_v40 = vcombine.low %v757_v35, %v773_v36 }
  0x33   :  { %3660 = vmatpush3.bf16.msra.mxu1 %v3859_v39  ;;  %v774_v39 = vld [vmem:[#allocation2 + $0x388] sm:$0xff] }
  0x34   :  { %3700 = vmatprep.subr.bf16.mxu1 %v4134_v45  ;;  %532 = vmatmul.mubr.bf16.vlgmr.msra.gmra.mrb[0].mxu0 %v89_v44  ;;  %v3512_v41 = vcombine.low %v758_v37, %v774_v39  ;;  %v3513_v42 = vcombine.high %v758_v37, %v774_v39  ;;  %v679_v44 = vld [vmem:[#allocation2 + $0x90] sm:$0xff]  ;;  %v681_v39 = vld [vmem:[#allocation2 + $0xa0] sm:$0xff] }
  0x35   :  { %3668 = vmatpush3.bf16.msra.mxu0 %v3862_v48  ;;  %611 = vmatprep.mubr.bf16.mxu0 %v94_v3  ;;  %v3419_v47 = vcombine.high %v663_v43, %v679_v44  ;;  %v680_v48 = vld [vmem:[#allocation2 + $0x98] sm:$0xff] }
  0x36   :  { %572 = vmatmul.mubr.bf16.vlgmr.msra.gmra.mrb[0].mxu1 %v91_v49  ;;  %3669 = vmatprep.subr.bf16.mxu0 %v3863_v50  ;;  %v3418_v49 = vcombine.low %v663_v43, %v679_v44  ;;  %v3420_v50 = vcombine.low %v664_v46, %v680_v48  ;;  %v3421_v51 = vcombine.high %v664_v46, %v680_v48  ;;  %v713_v48 = vld [vmem:[#allocation2 + $0x1a0] sm:$0xff] }
  0x37   :  { %3702 = vmatprep.mubr.msk.bf16.mxu1 %vm4135_vm0, %v4134_v45  ;;  %3701 = vmatpush3.bf16.msra.mxu1 %v3877_v58 }
  0x38   :  { %1474 = vmatprep.subr.bf16.mxu1 %v3417_v19 }
  0x39   :  { %3670 = vmatpush3.bf16.msra.mxu0 %v3864_v52  ;;  %v4136_v52 = vmov 0  }
  0x3a   :  { %3671 = vmatprep.subr.bf16.mxu0 %v3865_v53 }
  0x3d   :  { %3672 = vmatpush3.bf16.msra.mxu0 %v3866_v54  ;;  %v3363_v54 = vld [vmem:[%s5000_s2] ss:$0 sm:$0xff] }
  0x3e   :  { %3673 = vmatprep.subr.bf16.mxu0 %v3867_v55  ;;  %3703 = vmatmul.mubr.msk.bf16.vlgmr.msra.gmra.mrb[4].mxu1 %vm495_vm1, %v95_v4 }
  0x3f   :  { %1475 = vmatpush1.bf16.msra.mxu1 %v3416_v18  ;;  %1506 = vmatprep.mubr.bf16.mxu1 %v4136_v52 }
  0x40   :  { %1476 = vmatprep.subr.bf16.mxu1 %v3449_v23  ;;  %v728_v23 = vld [vmem:[#allocation2 + $0x218] sm:$0xff] }
  0x41   :  { %3674 = vmatpush3.bf16.msra.mxu0 %v3868_v56 }
  0x42   :  { %3675 = vmatprep.subr.bf16.mxu0 %v3869_v57 }
  0x43   :  { %1477 = vmatpush1.bf16.msra.mxu1 %v3448_v25 }
  0x44   :  { %1478 = vmatprep.subr.bf16.mxu1 %v3481_v34  ;;  %v3482_v34 = vcombine.low %v727_v21, %v743_v22 }
  0x45   :  { %3676 = vmatpush3.bf16.msra.mxu0 %v3870_v60 }
  0x46   :  { %3677 = vmatprep.subr.bf16.mxu0 %v3871_v63 }
  0x47   :  { %1479 = vmatpush1.bf16.msra.mxu1 %v3480_v33  ;;  %v776_v33 = vld [vmem:[#allocation2 + $0x398] sm:$0xff] }
  0x48   :  { %1480 = vmatprep.subr.bf16.mxu1 %v3513_v42 }
  0x49   :  { %3678 = vmatpush3.bf16.msra.mxu0 %v3872_v2 }
  0x4a   :  { %3679 = vmatprep.subr.bf16.mxu0 %v3873_v5 }
  0x4b   :  { %1481 = vmatpush1.bf16.msra.mxu1 %v3512_v41  ;;  %v682_v41 = vld [vmem:[#allocation2 + $0xa8] sm:$0xff] }
  0x4c   :  { %1556 = vmatprep.subr.bf16.mxu1 %v3421_v51 }
  0x4d   :  { %3680 = vmatpush3.bf16.msra.mxu0 %v3874_v6 }
  0x4e   :  { %3681 = vmatprep.subr.bf16.mxu0 %v3875_v7 }
  0x51   :  { %3682 = vmatpush3.bf16.msra.mxu0 %v3876_v8 }
  0x52   :  { %1433 = vmatprep.subr.bf16.mxu0 %v3415_v14  ;;  %v711_v14 = vld [vmem:[#allocation2 + $0x190] sm:$0xff] }
  0x54   :  { %612 = vmatmul.mubr.bf16.vlgmr.msra.gmra.mrb[4].mxu0 %v93_v9 }
  0x55   :  { %1434 = vmatpush1.bf16.msra.mxu0 %v3414_v13  ;;  %1465 = vmatprep.mubr.bf16.mxu0 %v4136_v52  ;;  %v695_v13 = vld [vmem:[#allocation2 + $0x110] sm:$0xff] }
  0x56   :  { %1435 = vmatprep.subr.bf16.mxu0 %v3447_v20  ;;  %v3451_v19 = vcombine.high %v695_v13, %v711_v14  ;;  %v3453_v20 = vcombine.high %v696_v15, %v712_v16  ;;  %v3450_v25 = vcombine.low %v695_v13, %v711_v14  ;;  %v699_v16 = vld [vmem:[#allocation2 + $0x130] sm:$0xff] }
  0x59   :  { %1436 = vmatpush1.bf16.msra.mxu0 %v3446_v24  ;;  %v744_v24 = vld [vmem:[#allocation2 + $0x298] sm:$0xff] }
  0x5a   :  { %1437 = vmatprep.subr.bf16.mxu0 %v3479_v30  ;;  %v3485_v28 = vcombine.high %v728_v23, %v744_v24  ;;  %v759_v30 = vld [vmem:[#allocation2 + $0x310] sm:$0xff]  ;;  %v3484_v35 = vcombine.low %v728_v23, %v744_v24 }
  0x5b   :  { %v3515_v36 = vcombine.high %v759_v30, %v775_v31  ;;  %v3514_v42 = vcombine.low %v759_v30, %v775_v31 }
  0x5d   :  { %1438 = vmatpush1.bf16.msra.mxu0 %v3478_v32  ;;  %v760_v32 = vld [vmem:[#allocation2 + $0x318] sm:$0xff] }
  0x5e   :  { %1439 = vmatprep.subr.bf16.mxu0 %v3511_v38  ;;  %v3517_v37 = vcombine.high %v760_v32, %v776_v33  ;;  %v665_v38 = vld [vmem:[#allocation2 + $0x20] sm:$0xff]  ;;  %v3516_v43 = vcombine.low %v760_v32, %v776_v33 }
  0x5f   :  { %v3423_v44 = vcombine.high %v665_v38, %v681_v39  ;;  %v3422_v51 = vcombine.low %v665_v38, %v681_v39 }
  0x61   :  { %1440 = vmatpush1.bf16.msra.mxu0 %v3510_v40  ;;  %v666_v40 = vld [vmem:[#allocation2 + $0x28] sm:$0xff] }
  0x62   :  { %1515 = vmatprep.subr.bf16.mxu0 %v3419_v47  ;;  %v3425_v46 = vcombine.high %v666_v40, %v682_v41  ;;  %v697_v47 = vld [vmem:[#allocation2 + $0x120] sm:$0xff] }
 0x107   :  { %v3639_v53 = vpop.f32.mrb[0].mxu0 }
 0x108   :  { %v3640_v55 = vpop.f32.mrb[1].mxu0 }
 0x109   :  { %v3641_v56 = vadd.f32 %v3640_v55, %v3639_v53  ;;  %v3642_v57 = vpop.f32.mrb[2].mxu0  ;;  %v3661_v58 = vpop.f32.mrb[0].mxu1  ;;  %v3424_v53 = vcombine.low %v666_v40, %v682_v41 }
 0x10a   :  { %v3643_v59 = vpop.f32.mrb[3].mxu0  ;;  %v3662_v60 = vpop.f32.mrb[1].mxu1  ;;  %v745_v57 = vld [vmem:[#allocation2 + $0x2a0] sm:$0xff] }
 0x10b   :  { %v534_v61 = vadd.f32 %v3641_v56, %v3363_v54  ;;  %v3663_v62 = vadd.f32 %v3662_v60, %v3661_v58  ;;  %v3664_v63 = vpop.f32.mrb[2].mxu1  ;;  %v3455_v54 = vcombine.high %v697_v47, %v713_v48  ;;  %v729_v56 = vld [vmem:[#allocation2 + $0x220] sm:$0xff]  ;;  %v730_v58 = vld [vmem:[#allocation2 + $0x228] sm:$0xff]  ;;  %v3454_v60 = vcombine.low %v697_v47, %v713_v48 }
 0x10c   :  { %v3665_v0 = vpop.f32.mrb[3].mxu1  ;;  %v746_v59 = vld [vmem:[#allocation2 + $0x2a8] sm:$0xff] }
 0x10d   :  { %v574_v1 = vadd.f32 %v3663_v62, %v534_v61  ;;  %v3487_v62 = vcombine.high %v729_v56, %v745_v57  ;;  %v3489_v63 = vcombine.high %v730_v58, %v746_v59  ;;  %v761_v0 = vld [vmem:[#allocation2 + $0x320] sm:$0xff] }
 0x111   :  { %v653_v2 = vpop.f32.mrb[4].mxu1 }
 0x112   :  { %v3704_v3 = vpop.f32.mrb[5].mxu1 }
 0x113   :  { %v656_v4 = vpop.f32.mrb[6].mxu1  ;;  %v778_v3 = vld [vmem:[#allocation2 + $0x3a8] sm:$0xff] }
 0x114   :  { %v3705_v5 = vpop.f32.mrb[7].mxu1  ;;  %v3486_v4 = vcombine.low %v729_v56, %v745_v57 }
 0x115   :  { %v3488_v5 = vcombine.low %v730_v58, %v746_v59 }
 0x127   :  { %v3683_v6 = vpop.f32.mrb[4].mxu0 }
 0x128   :  { %v3684_v7 = vpop.f32.mrb[5].mxu0 }
 0x129   :  { %v3685_v8 = vadd.f32 %v3684_v7, %v3683_v6  ;;  %v3686_v9 = vpop.f32.mrb[6].mxu0 }
 0x12a   :  { %v3687_v10 = vpop.f32.mrb[7].mxu0  ;;  %v683_v9 = vld [vmem:[#allocation2 + $0xb0] sm:$0xff] }
 0x12b   :  { %v614_v11 = vadd.f32 %v3685_v8, %v574_v1  ;;  %v777_v1 = vld [vmem:[#allocation2 + $0x3a0] sm:$0xff]  ;;  %v667_v8 = vld [vmem:[#allocation2 + $0x30] sm:$0xff]  ;;  %v668_v10 = vld [vmem:[#allocation2 + $0x38] sm:$0xff] }
 0x12c   :  { %v3519_v6 = vcombine.high %v761_v0, %v777_v1  ;;  %v3427_v14 = vcombine.high %v667_v8, %v683_v9  ;;  %v3426_v21 = vcombine.low %v667_v8, %v683_v9 }
 0x12d   :  { %v654_v12 = vadd.f32 %v653_v2, %v614_v11  ;;  %v762_v2 = vld [vmem:[#allocation2 + $0x328] sm:$0xff]  ;;  %v684_v11 = vld [vmem:[#allocation2 + $0xb8] sm:$0xff] }
 0x12e   :  { %v3521_v7 = vcombine.high %v762_v2, %v778_v3  ;;  %v3520_v13 = vcombine.low %v762_v2, %v778_v3  ;;  %v3429_v15 = vcombine.high %v668_v10, %v684_v11  ;;  %v3428_v22 = vcombine.low %v668_v10, %v684_v11 }
 0x12f   :  { %v659_v17 = vmax.f32 %v654_v12, 0.0  ;;  %v3518_v12 = vcombine.low %v761_v0, %v777_v1 }
 0x131   :  { %v4359_v18 = vpack.c.bf16 %v659_v17, %v659_v17  ;;  %v715_v17 = vld [vmem:[#allocation2 + $0x1b0] sm:$0xff] }
 0x132   :  { %v3459_v23 = vcombine.high %v699_v16, %v715_v17  ;;  %v3458_v30 = vcombine.low %v699_v16, %v715_v17 }
 0x133   :  { %3542 = vmatmul.mubr.msk.bf16.vlgmr.msra.gmra.mrb[8].mxu0 %vm1429_vm2, %v4359_v18  ;;  %3543 = vmatmul.mubr.msk.bf16.vlgmr.msra.gmra.mrb[8].mxu1 %vm1429_vm2, %v4359_v18 }
 0x134   :  { %1516 = vmatpush1.bf16.msra.mxu0 %v3418_v49  ;;  %1557 = vmatpush1.bf16.msra.mxu1 %v3420_v50  ;;  %v698_v49 = vld [vmem:[#allocation2 + $0x128] sm:$0xff] }
 0x135   :  { %1517 = vmatprep.subr.bf16.mxu0 %v3451_v19  ;;  %1558 = vmatprep.subr.bf16.mxu1 %v3453_v20  ;;  %v714_v50 = vld [vmem:[#allocation2 + $0x1a8] sm:$0xff]  ;;  %v700_v19 = vld [vmem:[#allocation2 + $0x138] sm:$0xff] }
 0x136   :  { %1547 = vmatprep.mubr.bf16.mxu0 %v4136_v52  ;;  %1588 = vmatprep.mubr.bf16.mxu1 %v4136_v52  ;;  %v3457_v55 = vcombine.high %v698_v49, %v714_v50  ;;  %v3456_v61 = vcombine.low %v698_v49, %v714_v50  ;;  %v716_v20 = vld [vmem:[#allocation2 + $0x1b8] sm:$0xff] }
 0x137   :  { %v3461_v24 = vcombine.high %v700_v19, %v716_v20  ;;  %v3460_v31 = vcombine.low %v700_v19, %v716_v20 }
 0x138   :  { %1518 = vmatpush1.bf16.msra.mxu0 %v3450_v25  ;;  %1559 = vmatpush1.bf16.msra.mxu1 %v3452_v26  ;;  %v731_v25 = vld [vmem:[#allocation2 + $0x230] sm:$0xff] }
 0x139   :  { %1519 = vmatprep.subr.bf16.mxu0 %v3483_v27  ;;  %1560 = vmatprep.subr.bf16.mxu1 %v3485_v28  ;;  %v747_v26 = vld [vmem:[#allocation2 + $0x2b0] sm:$0xff]  ;;  %v732_v27 = vld [vmem:[#allocation2 + $0x238] sm:$0xff] }
 0x13a   :  { %v748_v28 = vld [vmem:[#allocation2 + $0x2b8] sm:$0xff]  ;;  %v3491_v32 = vcombine.high %v731_v25, %v747_v26  ;;  %v3490_v38 = vcombine.low %v731_v25, %v747_v26 }
 0x13b   :  { %v3493_v33 = vcombine.high %v732_v27, %v748_v28  ;;  %v3492_v39 = vcombine.low %v732_v27, %v748_v28 }
 0x13c   :  { %1520 = vmatpush1.bf16.msra.mxu0 %v3482_v34  ;;  %1561 = vmatpush1.bf16.msra.mxu1 %v3484_v35  ;;  %v763_v34 = vld [vmem:[#allocation2 + $0x330] sm:$0xff] }
 0x13d   :  { %1521 = vmatprep.subr.bf16.mxu0 %v3515_v36  ;;  %1562 = vmatprep.subr.bf16.mxu1 %v3517_v37  ;;  %v779_v35 = vld [vmem:[#allocation2 + $0x3b0] sm:$0xff]  ;;  %v764_v36 = vld [vmem:[#allocation2 + $0x338] sm:$0xff] }
 0x13e   :  { %v780_v37 = vld [vmem:[#allocation2 + $0x3b8] sm:$0xff]  ;;  %v3523_v40 = vcombine.high %v763_v34, %v779_v35  ;;  %v3522_v47 = vcombine.low %v763_v34, %v779_v35 }
 0x13f   :  { %v3525_v41 = vcombine.high %v764_v36, %v780_v37  ;;  %v3524_v48 = vcombine.low %v764_v36, %v780_v37 }
 0x140   :  { %1522 = vmatpush1.bf16.msra.mxu0 %v3514_v42  ;;  %1563 = vmatpush1.bf16.msra.mxu1 %v3516_v43  ;;  %v669_v42 = vld [vmem:[#allocation2 + $0x40] sm:$0xff] }
 0x141   :  { %1597 = vmatprep.subr.bf16.mxu0 %v3423_v44  ;;  %1638 = vmatprep.subr.bf16.mxu1 %v3425_v46  ;;  %v685_v43 = vld [vmem:[#allocation2 + $0xc0] sm:$0xff]  ;;  %v670_v44 = vld [vmem:[#allocation2 + $0x48] sm:$0xff] }
 0x142   :  { %v686_v46 = vld [vmem:[#allocation2 + $0xc8] sm:$0xff]  ;;  %v3431_v49 = vcombine.high %v669_v42, %v685_v43  ;;  %v3430_v56 = vcombine.low %v669_v42, %v685_v43 }
 0x143   :  { %3544 = vmatmul.mubr.msk.bf16.vlgmr.msra.gmra.mrb[12].mxu0 %vm1429_vm2, %v4359_v18  ;;  %3545 = vmatmul.mubr.msk.bf16.vlgmr.msra.gmra.mrb[12].mxu1 %vm1429_vm2, %v4359_v18  ;;  %v3433_v50 = vcombine.high %v670_v44, %v686_v46  ;;  %v3432_v57 = vcombine.low %v670_v44, %v686_v46 }
 0x144   :  { %1598 = vmatpush1.bf16.msra.mxu0 %v3422_v51  ;;  %1639 = vmatpush1.bf16.msra.mxu1 %v3424_v53  ;;  %v701_v51 = vld [vmem:[#allocation2 + $0x140] sm:$0xff] }
 0x145   :  { %1599 = vmatprep.subr.bf16.mxu0 %v3455_v54  ;;  %1640 = vmatprep.subr.bf16.mxu1 %v3457_v55  ;;  %v717_v53 = vld [vmem:[#allocation2 + $0x1c0] sm:$0xff]  ;;  %v702_v54 = vld [vmem:[#allocation2 + $0x148] sm:$0xff] }
 0x146   :  { %1629 = vmatprep.mubr.bf16.mxu0 %v4136_v52  ;;  %1670 = vmatprep.mubr.bf16.mxu1 %v4136_v52  ;;  %v718_v55 = vld [vmem:[#allocation2 + $0x1c8] sm:$0xff]  ;;  %v3463_v58 = vcombine.high %v701_v51, %v717_v53  ;;  %v3462_v0 = vcombine.low %v701_v51, %v717_v53 }
 0x147   :  { %v3465_v59 = vcombine.high %v702_v54, %v718_v55  ;;  %v3464_v1 = vcombine.low %v702_v54, %v718_v55 }
 0x148   :  { %1600 = vmatpush1.bf16.msra.mxu0 %v3454_v60  ;;  %1641 = vmatpush1.bf16.msra.mxu1 %v3456_v61  ;;  %v733_v60 = vld [vmem:[#allocation2 + $0x240] sm:$0xff] }
 0x149   :  { %1601 = vmatprep.subr.bf16.mxu0 %v3487_v62  ;;  %1642 = vmatprep.subr.bf16.mxu1 %v3489_v63  ;;  %v749_v61 = vld [vmem:[#allocation2 + $0x2c0] sm:$0xff]  ;;  %v734_v62 = vld [vmem:[#allocation2 + $0x248] sm:$0xff] }
 0x14a   :  { %v750_v63 = vld [vmem:[#allocation2 + $0x2c8] sm:$0xff]  ;;  %v3495_v2 = vcombine.high %v733_v60, %v749_v61  ;;  %v3494_v8 = vcombine.low %v733_v60, %v749_v61 }
 0x14b   :  { %v3497_v3 = vcombine.high %v734_v62, %v750_v63  ;;  %v3496_v9 = vcombine.low %v734_v62, %v750_v63 }
 0x14c   :  { %1602 = vmatpush1.bf16.msra.mxu0 %v3486_v4  ;;  %1643 = vmatpush1.bf16.msra.mxu1 %v3488_v5  ;;  %v765_v4 = vld [vmem:[#allocation2 + $0x340] sm:$0xff] }
 0x14d   :  { %1603 = vmatprep.subr.bf16.mxu0 %v3519_v6  ;;  %1644 = vmatprep.subr.bf16.mxu1 %v3521_v7  ;;  %v781_v5 = vld [vmem:[#allocation2 + $0x3c0] sm:$0xff]  ;;  %v766_v6 = vld [vmem:[#allocation2 + $0x348] sm:$0xff] }
 0x14e   :  { %v782_v7 = vld [vmem:[#allocation2 + $0x3c8] sm:$0xff]  ;;  %v3527_v10 = vcombine.high %v765_v4, %v781_v5  ;;  %v3526_v16 = vcombine.low %v765_v4, %v781_v5 }
 0x14f   :  { %v3529_v11 = vcombine.high %v766_v6, %v782_v7  ;;  %v3528_v17 = vcombine.low %v766_v6, %v782_v7 }
 0x150   :  { %1604 = vmatpush1.bf16.msra.mxu0 %v3518_v12  ;;  %1645 = vmatpush1.bf16.msra.mxu1 %v3520_v13  ;;  %v671_v12 = vld [vmem:[#allocation2 + $0x50] sm:$0xff] }
 0x151   :  { %1679 = vmatprep.subr.bf16.mxu0 %v3427_v14  ;;  %1720 = vmatprep.subr.bf16.mxu1 %v3429_v15  ;;  %v687_v13 = vld [vmem:[#allocation2 + $0xd0] sm:$0xff]  ;;  %v672_v14 = vld [vmem:[#allocation2 + $0x58] sm:$0xff] }
 0x152   :  { %v688_v15 = vld [vmem:[#allocation2 + $0xd8] sm:$0xff]  ;;  %v3435_v19 = vcombine.high %v671_v12, %v687_v13  ;;  %v3434_v25 = vcombine.low %v671_v12, %v687_v13 }
 0x153   :  { %3546 = vmatmul.mubr.msk.bf16.vlgmr.msra.gmra.mrb[16].mxu0 %vm1429_vm2, %v4359_v18  ;;  %3547 = vmatmul.mubr.msk.bf16.vlgmr.msra.gmra.mrb[16].mxu1 %vm1429_vm2, %v4359_v18  ;;  %v3437_v20 = vcombine.high %v672_v14, %v688_v15  ;;  %v3436_v26 = vcombine.low %v672_v14, %v688_v15 }
 0x154   :  { %1680 = vmatpush1.bf16.msra.mxu0 %v3426_v21  ;;  %1721 = vmatpush1.bf16.msra.mxu1 %v3428_v22  ;;  %v703_v21 = vld [vmem:[#allocation2 + $0x150] sm:$0xff] }
 0x155   :  { %1681 = vmatprep.subr.bf16.mxu0 %v3459_v23  ;;  %1722 = vmatprep.subr.bf16.mxu1 %v3461_v24  ;;  %v719_v22 = vld [vmem:[#allocation2 + $0x1d0] sm:$0xff]  ;;  %v704_v23 = vld [vmem:[#allocation2 + $0x158] sm:$0xff] }
 0x156   :  { %1711 = vmatprep.mubr.bf16.mxu0 %v4136_v52  ;;  %1752 = vmatprep.mubr.bf16.mxu1 %v4136_v52  ;;  %v720_v24 = vld [vmem:[#allocation2 + $0x1d8] sm:$0xff]  ;;  %v3467_v27 = vcombine.high %v703_v21, %v719_v22  ;;  %v3466_v34 = vcombine.low %v703_v21, %v719_v22 }
 0x157   :  { %v3469_v28 = vcombine.high %v704_v23, %v720_v24  ;;  %v3468_v35 = vcombine.low %v704_v23, %v720_v24 }
 0x158   :  { %1682 = vmatpush1.bf16.msra.mxu0 %v3458_v30  ;;  %1723 = vmatpush1.bf16.msra.mxu1 %v3460_v31  ;;  %v735_v30 = vld [vmem:[#allocation2 + $0x250] sm:$0xff] }
 0x159   :  { %1683 = vmatprep.subr.bf16.mxu0 %v3491_v32  ;;  %1724 = vmatprep.subr.bf16.mxu1 %v3493_v33  ;;  %v751_v31 = vld [vmem:[#allocation2 + $0x2d0] sm:$0xff]  ;;  %v736_v32 = vld [vmem:[#allocation2 + $0x258] sm:$0xff] }
 0x15a   :  { %v752_v33 = vld [vmem:[#allocation2 + $0x2d8] sm:$0xff]  ;;  %v3499_v36 = vcombine.high %v735_v30, %v751_v31  ;;  %v3498_v42 = vcombine.low %v735_v30, %v751_v31 }
 0x15b   :  { %v3501_v37 = vcombine.high %v736_v32, %v752_v33  ;;  %v3500_v43 = vcombine.low %v736_v32, %v752_v33 }
 0x15c   :  { %1684 = vmatpush1.bf16.msra.mxu0 %v3490_v38  ;;  %1725 = vmatpush1.bf16.msra.mxu1 %v3492_v39  ;;  %v767_v38 = vld [vmem:[#allocation2 + $0x350] sm:$0xff] }
 0x15d   :  { %1685 = vmatprep.subr.bf16.mxu0 %v3523_v40  ;;  %1726 = vmatprep.subr.bf16.mxu1 %v3525_v41  ;;  %v783_v39 = vld [vmem:[#allocation2 + $0x3d0] sm:$0xff]  ;;  %v768_v40 = vld [vmem:[#allocation2 + $0x358] sm:$0xff] }
 0x15e   :  { %v784_v41 = vld [vmem:[#allocation2 + $0x3d8] sm:$0xff]  ;;  %v3531_v44 = vcombine.high %v767_v38, %v783_v39  ;;  %v3530_v51 = vcombine.low %v767_v38, %v783_v39 }
 0x15f   :  { %v3533_v46 = vcombine.high %v768_v40, %v784_v41  ;;  %v3532_v53 = vcombine.low %v768_v40, %v784_v41 }
 0x160   :  { %1686 = vmatpush1.bf16.msra.mxu0 %v3522_v47  ;;  %1727 = vmatpush1.bf16.msra.mxu1 %v3524_v48  ;;  %v673_v47 = vld [vmem:[#allocation2 + $0x60] sm:$0xff] }
 0x161   :  { %1761 = vmatprep.subr.bf16.mxu0 %v3431_v49  ;;  %1802 = vmatprep.subr.bf16.mxu1 %v3433_v50  ;;  %v689_v48 = vld [vmem:[#allocation2 + $0xe0] sm:$0xff]  ;;  %v674_v49 = vld [vmem:[#allocation2 + $0x68] sm:$0xff] }
 0x162   :  { %v690_v50 = vld [vmem:[#allocation2 + $0xe8] sm:$0xff]  ;;  %v3439_v54 = vcombine.high %v673_v47, %v689_v48  ;;  %v3438_v60 = vcombine.low %v673_v47, %v689_v48 }
 0x163   :  { %3548 = vmatmul.mubr.msk.bf16.vlgmr.msra.gmra.mrb[20].mxu0 %vm1429_vm2, %v4359_v18  ;;  %3549 = vmatmul.mubr.msk.bf16.vlgmr.msra.gmra.mrb[20].mxu1 %vm1429_vm2, %v4359_v18  ;;  %v3441_v55 = vcombine.high %v674_v49, %v690_v50  ;;  %v3440_v61 = vcombine.low %v674_v49, %v690_v50 }
 0x164   :  { %1762 = vmatpush1.bf16.msra.mxu0 %v3430_v56  ;;  %1803 = vmatpush1.bf16.msra.mxu1 %v3432_v57  ;;  %v705_v56 = vld [vmem:[#allocation2 + $0x160] sm:$0xff] }
 0x165   :  { %1763 = vmatprep.subr.bf16.mxu0 %v3463_v58  ;;  %1804 = vmatprep.subr.bf16.mxu1 %v3465_v59  ;;  %v721_v57 = vld [vmem:[#allocation2 + $0x1e0] sm:$0xff]  ;;  %v706_v58 = vld [vmem:[#allocation2 + $0x168] sm:$0xff] }
 0x166   :  { %1793 = vmatprep.mubr.bf16.mxu0 %v4136_v52  ;;  %1834 = vmatprep.mubr.bf16.mxu1 %v4136_v52  ;;  %v722_v59 = vld [vmem:[#allocation2 + $0x1e8] sm:$0xff]  ;;  %v3471_v62 = vcombine.high %v705_v56, %v721_v57  ;;  %v3470_v4 = vcombine.low %v705_v56, %v721_v57  ;;  %v4417_v56 = vld [vmem:[%s5002_s4 + $0x24] ss:$16 sps:$4 sm:$0xff]   ;;  %v4428_v57 = vld [vmem:[%s5002_s4 + $0x20] ss:$16 sps:$4 sm:$0xff]  }
 0x167   :  { %v3473_v63 = vcombine.high %v706_v58, %v722_v59  ;;  %v3472_v5 = vcombine.low %v706_v58, %v722_v59  ;;  %v4435_v58 = vld [vmem:[%s5002_s4 + $0x44] ss:$16 sps:$4 sm:$0xff]  }
 0x168   :  { %1764 = vmatpush1.bf16.msra.mxu0 %v3462_v0  ;;  %1805 = vmatpush1.bf16.msra.mxu1 %v3464_v1  ;;  %v737_v0 = vld [vmem:[#allocation2 + $0x260] sm:$0xff] }
 0x169   :  { %1765 = vmatprep.subr.bf16.mxu0 %v3495_v2  ;;  %1806 = vmatprep.subr.bf16.mxu1 %v3497_v3  ;;  %v753_v1 = vld [vmem:[#allocation2 + $0x2e0] sm:$0xff]  ;;  %v738_v2 = vld [vmem:[#allocation2 + $0x268] sm:$0xff] }
 0x16a   :  { %v754_v3 = vld [vmem:[#allocation2 + $0x2e8] sm:$0xff]  ;;  %v3503_v6 = vcombine.high %v737_v0, %v753_v1  ;;  %v3502_v12 = vcombine.low %v737_v0, %v753_v1  ;;  %v4450_v59 = vld [vmem:[%s5002_s4 + $0x64] ss:$16 sps:$4 sm:$0xff]   ;;  %v4486_v0 = vld [vmem:[%s5002_s4 + $0xa0] ss:$16 sps:$4 sm:$0xff]  }
 0x16b   :  { %v3505_v7 = vcombine.high %v738_v2, %v754_v3  ;;  %v3504_v13 = vcombine.low %v738_v2, %v754_v3  ;;  %v4492_v1 = vld [vmem:[%s5002_s4 + $0xc4] ss:$16 sps:$4 sm:$0xff]   ;;  %v4500_v2 = vld [vmem:[%s5002_s4 + $0xc0] ss:$16 sps:$4 sm:$0xff]  }
 0x16c   :  { %1766 = vmatpush1.bf16.msra.mxu0 %v3494_v8  ;;  %1807 = vmatpush1.bf16.msra.mxu1 %v3496_v9  ;;  %v769_v8 = vld [vmem:[#allocation2 + $0x360] sm:$0xff] }
 0x16d   :  { %1767 = vmatprep.subr.bf16.mxu0 %v3527_v10  ;;  %1808 = vmatprep.subr.bf16.mxu1 %v3529_v11  ;;  %v785_v9 = vld [vmem:[#allocation2 + $0x3e0] sm:$0xff]  ;;  %v770_v10 = vld [vmem:[#allocation2 + $0x368] sm:$0xff] }
 0x16e   :  { %v786_v11 = vld [vmem:[#allocation2 + $0x3e8] sm:$0xff]  ;;  %v3535_v14 = vcombine.high %v769_v8, %v785_v9  ;;  %v3534_v21 = vcombine.low %v769_v8, %v785_v9  ;;  %v4506_v3 = vld [vmem:[%s5002_s4 + $0xe4] ss:$16 sps:$4 sm:$0xff]  }
 0x16f   :  { %v3537_v15 = vcombine.high %v770_v10, %v786_v11  ;;  %v3536_v22 = vcombine.low %v770_v10, %v786_v11  ;;  %v4543_v8 = vld [vmem:[%s5002_s4 + $0x28] ss:$16 sps:$4 sm:$0xff]   ;;  %v4550_v9 = vld [vmem:[%s5002_s4 + $0x4c] ss:$16 sps:$4 sm:$0xff]  }
 0x170   :  { %1768 = vmatpush1.bf16.msra.mxu0 %v3526_v16  ;;  %1809 = vmatpush1.bf16.msra.mxu1 %v3528_v17  ;;  %v675_v16 = vld [vmem:[#allocation2 + $0x70] sm:$0xff]  ;;  %v4556_v10 = vld [vmem:[%s5002_s4 + $0x48] ss:$16 sps:$4 sm:$0xff]   ;;  %v4562_v11 = vld [vmem:[%s5002_s4 + $0x6c] ss:$16 sps:$4 sm:$0xff]  }
 0x171   :  { %1843 = vmatprep.subr.bf16.mxu0 %v3435_v19  ;;  %1884 = vmatprep.subr.bf16.mxu1 %v3437_v20  ;;  %v691_v17 = vld [vmem:[#allocation2 + $0xf0] sm:$0xff]  ;;  %v676_v19 = vld [vmem:[#allocation2 + $0x78] sm:$0xff] }
 0x172   :  { %v692_v20 = vld [vmem:[#allocation2 + $0xf8] sm:$0xff]  ;;  %v3443_v23 = vcombine.high %v675_v16, %v691_v17  ;;  %v3442_v30 = vcombine.low %v675_v16, %v691_v17 }
 0x173   :  { %3550 = vmatmul.mubr.msk.bf16.vlgmr.msra.gmra.mrb[24].mxu0 %vm1429_vm2, %v4359_v18  ;;  %3551 = vmatmul.mubr.msk.bf16.vlgmr.msra.gmra.mrb[24].mxu1 %vm1429_vm2, %v4359_v18  ;;  %v3445_v24 = vcombine.high %v676_v19, %v692_v20  ;;  %v3444_v31 = vcombine.low %v676_v19, %v692_v20  ;;  %v4592_v16 = vld [vmem:[%s5002_s4 + $0xa8] ss:$16 sps:$4 sm:$0xff]   ;;  %v4598_v17 = vld [vmem:[%s5002_s4 + $0xcc] ss:$16 sps:$4 sm:$0xff]  }
 0x174   :  { %1844 = vmatpush1.bf16.msra.mxu0 %v3434_v25  ;;  %1885 = vmatpush1.bf16.msra.mxu1 %v3436_v26  ;;  %v707_v25 = vld [vmem:[#allocation2 + $0x170] sm:$0xff]  ;;  %v4604_v19 = vld [vmem:[%s5002_s4 + $0xc8] ss:$16 sps:$4 sm:$0xff]   ;;  %v4610_v20 = vld [vmem:[%s5002_s4 + $0xec] ss:$16 sps:$4 sm:$0xff]  }
 0x175   :  { %1845 = vmatprep.subr.bf16.mxu0 %v3467_v27  ;;  %1886 = vmatprep.subr.bf16.mxu1 %v3469_v28  ;;  %v723_v26 = vld [vmem:[#allocation2 + $0x1f0] sm:$0xff]  ;;  %v708_v27 = vld [vmem:[#allocation2 + $0x178] sm:$0xff] }
 0x176   :  { %1875 = vmatprep.mubr.bf16.mxu0 %v4136_v52  ;;  %1916 = vmatprep.mubr.bf16.mxu1 %v4136_v52  ;;  %v724_v28 = vld [vmem:[#allocation2 + $0x1f8] sm:$0xff]  ;;  %v3475_v32 = vcombine.high %v707_v25, %v723_v26  ;;  %v3474_v38 = vcombine.low %v707_v25, %v723_v26  ;;  %v2093_v26 = vsub.s32 0, %v4270_v29 }
 0x177   :  { %v3477_v33 = vcombine.high %v708_v27, %v724_v28  ;;  %v3476_v39 = vcombine.low %v708_v27, %v724_v28  ;;  %v2089_v27 = vld [vmem:[%s5003_s5] sm:$0xf]  ;;  %v2097_v28 = vsub.s32 1, %v4270_v29 }
 0x178   :  { %1846 = vmatpush1.bf16.msra.mxu0 %v3466_v34  ;;  %1887 = vmatpush1.bf16.msra.mxu1 %v3468_v35  ;;  %v739_v34 = vld [vmem:[#allocation2 + $0x270] sm:$0xff] }
 0x179   :  { %1847 = vmatprep.subr.bf16.mxu0 %v3499_v36  ;;  %1888 = vmatprep.subr.bf16.mxu1 %v3501_v37  ;;  %v755_v35 = vld [vmem:[#allocation2 + $0x2f0] sm:$0xff]  ;;  %v740_v36 = vld [vmem:[#allocation2 + $0x278] sm:$0xff] }
 0x17a   :  { %v756_v37 = vld [vmem:[#allocation2 + $0x2f8] sm:$0xff]  ;;  %v3507_v40 = vcombine.high %v739_v34, %v755_v35  ;;  %v3506_v47 = vcombine.low %v739_v34, %v755_v35 }
 0x17b   :  { %v3509_v41 = vcombine.high %v740_v36, %v756_v37  ;;  %v3508_v48 = vcombine.low %v740_v36, %v756_v37 }
 0x17c   :  { %1848 = vmatpush1.bf16.msra.mxu0 %v3498_v42  ;;  %1889 = vmatpush1.bf16.msra.mxu1 %v3500_v43  ;;  %v771_v42 = vld [vmem:[#allocation2 + $0x370] sm:$0xff] }
 0x17d   :  { %1849 = vmatprep.subr.bf16.mxu0 %v3531_v44  ;;  %1890 = vmatprep.subr.bf16.mxu1 %v3533_v46  ;;  %v787_v43 = vld [vmem:[#allocation2 + $0x3f0] sm:$0xff]  ;;  %v772_v44 = vld [vmem:[#allocation2 + $0x378] sm:$0xff] }
 0x17e   :  { %v788_v46 = vld [vmem:[#allocation2 + $0x3f8] sm:$0xff]  ;;  %v3539_v49 = vcombine.high %v771_v42, %v787_v43 }
 0x17f   :  { %v3541_v50 = vcombine.high %v772_v44, %v788_v46 }
 0x180   :  { %1850 = vmatpush1.bf16.msra.mxu0 %v3530_v51  ;;  %1891 = vmatpush1.bf16.msra.mxu1 %v3532_v53  ;;  %v3538_v51 = vcombine.low %v771_v42, %v787_v43  ;;  %v3540_v53 = vcombine.low %v772_v44, %v788_v46  ;;  %v2101_v42 = vsub.s32 2, %v4270_v29  ;;  %v2105_v44 = vsub.s32 3, %v4270_v29 }
 0x181   :  { %1925 = vmatprep.subr.bf16.mxu0 %v3439_v54  ;;  %1966 = vmatprep.subr.bf16.mxu1 %v3441_v55  ;;  %v4406_v54 = vld [vmem:[%s5002_s4 + $0x4] ss:$16 sps:$4 sm:$0xff]   ;;  %v4411_v55 = vld [vmem:[%s5002_s4] ss:$16 sps:$4 sm:$0xff]  }
 0x183   :  { %3552 = vmatmul.mubr.msk.bf16.vlgmr.msra.gmra.mrb[28].mxu0 %vm1429_vm2, %v4359_v18  ;;  %3553 = vmatmul.mubr.msk.bf16.vlgmr.msra.gmra.mrb[28].mxu1 %vm1429_vm2, %v4359_v18 }
 0x184   :  { %1926 = vmatpush1.bf16.msra.mxu0 %v3438_v60  ;;  %1967 = vmatpush1.bf16.msra.mxu1 %v3440_v61  ;;  %v4458_v60 = vld [vmem:[%s5002_s4 + $0x60] ss:$16 sps:$4 sm:$0xff]   ;;  %v4464_v61 = vld [vmem:[%s5002_s4 + $0x84] ss:$16 sps:$4 sm:$0xff]  }
 0x185   :  { %1927 = vmatprep.subr.bf16.mxu0 %v3471_v62  ;;  %1968 = vmatprep.subr.bf16.mxu1 %v3473_v63  ;;  %v4472_v62 = vld [vmem:[%s5002_s4 + $0x80] ss:$16 sps:$4 sm:$0xff]   ;;  %v4478_v63 = vld [vmem:[%s5002_s4 + $0xa4] ss:$16 sps:$4 sm:$0xff]  }
 0x186   :  { %1957 = vmatprep.mubr.bf16.mxu0 %v4136_v52  ;;  %1998 = vmatprep.mubr.bf16.mxu1 %v4136_v52 }
 0x188   :  { %1928 = vmatpush1.bf16.msra.mxu0 %v3470_v4  ;;  %1969 = vmatpush1.bf16.msra.mxu1 %v3472_v5  ;;  %v4514_v4 = vld [vmem:[%s5002_s4 + $0xe0] ss:$16 sps:$4 sm:$0xff]   ;;  %v4520_v5 = vld [vmem:[%s5002_s4 + $0xc] ss:$16 sps:$4 sm:$0xff]  }
 0x189   :  { %1929 = vmatprep.subr.bf16.mxu0 %v3503_v6  ;;  %1970 = vmatprep.subr.bf16.mxu1 %v3505_v7  ;;  %v4528_v6 = vld [vmem:[%s5002_s4 + $0x8] ss:$16 sps:$4 sm:$0xff]   ;;  %v4534_v7 = vld [vmem:[%s5002_s4 + $0x2c] ss:$16 sps:$4 sm:$0xff]  }
 0x18c   :  { %1930 = vmatpush1.bf16.msra.mxu0 %v3502_v12  ;;  %1971 = vmatpush1.bf16.msra.mxu1 %v3504_v13  ;;  %v4568_v12 = vld [vmem:[%s5002_s4 + $0x68] ss:$16 sps:$4 sm:$0xff]   ;;  %v4574_v13 = vld [vmem:[%s5002_s4 + $0x8c] ss:$16 sps:$4 sm:$0xff]  }
 0x18d   :  { %1931 = vmatprep.subr.bf16.mxu0 %v3535_v14  ;;  %1972 = vmatprep.subr.bf16.mxu1 %v3537_v15  ;;  %v4580_v14 = vld [vmem:[%s5002_s4 + $0x88] ss:$16 sps:$4 sm:$0xff]   ;;  %v4586_v15 = vld [vmem:[%s5002_s4 + $0xac] ss:$16 sps:$4 sm:$0xff]  }
 0x190   :  { %1932 = vmatpush1.bf16.msra.mxu0 %v3534_v21  ;;  %1973 = vmatpush1.bf16.msra.mxu1 %v3536_v22  ;;  %v4616_v21 = vld [vmem:[%s5002_s4 + $0xe8] ss:$16 sps:$4 sm:$0xff]  }
 0x191   :  { %2007 = vmatprep.subr.bf16.mxu0 %v3443_v23  ;;  %2048 = vmatprep.subr.bf16.mxu1 %v3445_v24 }
 0x193   :  { %3554 = vmatmul.mubr.msk.bf16.vlgmr.msra.gmra.mrb[32].mxu0 %vm1429_vm2, %v4359_v18  ;;  %3555 = vmatmul.mubr.msk.bf16.vlgmr.msra.gmra.mrb[32].mxu1 %vm1429_vm2, %v4359_v18 }
 0x194   :  { %2008 = vmatpush1.bf16.msra.mxu0 %v3442_v30  ;;  %2049 = vmatpush1.bf16.msra.mxu1 %v3444_v31  ;;  %v4644_v30 = vrot.slane %v2089_v27, %v2093_v26  ;;  %v4646_v31 = vrot.slane %v2089_v27, %v2097_v28 }
 0x195   :  { %2009 = vmatprep.subr.bf16.mxu0 %v3475_v32  ;;  %2050 = vmatprep.subr.bf16.mxu1 %v3477_v33 }
 0x196   :  { %2039 = vmatprep.mubr.bf16.mxu0 %v4136_v52  ;;  %2080 = vmatprep.mubr.bf16.mxu1 %v4136_v52 }
 0x198   :  { %2010 = vmatpush1.bf16.msra.mxu0 %v3474_v38  ;;  %2051 = vmatpush1.bf16.msra.mxu1 %v3476_v39 }
 0x199   :  { %2011 = vmatprep.subr.bf16.mxu0 %v3507_v40  ;;  %2052 = vmatprep.subr.bf16.mxu1 %v3509_v41 }
 0x19c   :  { %2012 = vmatpush1.bf16.msra.mxu0 %v3506_v47  ;;  %2053 = vmatpush1.bf16.msra.mxu1 %v3508_v48  ;;  %v4652_v48 = vrot.slane %v2089_v27, %v2101_v42 }
 0x19d   :  { %2013 = vmatprep.subr.bf16.mxu0 %v3539_v49  ;;  %2054 = vmatprep.subr.bf16.mxu1 %v3541_v50  ;;  %v4654_v50 = vrot.slane %v2089_v27, %v2105_v44 }
 0x1a0   :  { %2014 = vmatpush1.bf16.msra.mxu0 %v3538_v51  ;;  %2055 = vmatpush1.bf16.msra.mxu1 %v3540_v53 }
 0x1a1   :  { %2307 = vmatprep.subr.bf16.mxu1 %v4406_v54  ;;  %2422 = vmatprep.subr.bf16.mxu0 %v4406_v54 }
 0x1a3   :  { %3556 = vmatmul.mubr.msk.bf16.vlgmr.msra.gmra.mrb[36].mxu0 %vm1429_vm2, %v4359_v18  ;;  %3557 = vmatmul.mubr.msk.bf16.vlgmr.msra.gmra.mrb[36].mxu1 %vm1429_vm2, %v4359_v18  ;;  %v4444_v18 = vld [vmem:[%s5002_s4 + $0x40] ss:$16 sps:$4 sm:$0xff]  }
 0x1a4   :  { %2308 = vmatpush1.bf16.msra.mxu1 %v4411_v55  ;;  %2339 = vmatprep.mubr.bf16.mxu1 %v4136_v52 }
 0x1a5   :  { %2309 = vmatprep.subr.bf16.mxu1 %v4417_v56  ;;  %2423 = vmatpush1.bf16.msra.mxu0 %v4411_v55 }
 0x1a6   :  { %2424 = vmatprep.subr.bf16.mxu0 %v4417_v56  ;;  %2454 = vmatprep.mubr.bf16.mxu0 %v4136_v52 }
 0x1a8   :  { %2310 = vmatpush1.bf16.msra.mxu1 %v4428_v57 }
 0x1a9   :  { %2311 = vmatprep.subr.bf16.mxu1 %v4435_v58  ;;  %2425 = vmatpush1.bf16.msra.mxu0 %v4428_v57 }
 0x1aa   :  { %2426 = vmatprep.subr.bf16.mxu0 %v4435_v58 }
 0x1ac   :  { %2312 = vmatpush1.bf16.msra.mxu1 %v4444_v18 }
 0x1ad   :  { %2313 = vmatprep.subr.bf16.mxu1 %v4450_v59  ;;  %2427 = vmatpush1.bf16.msra.mxu0 %v4444_v18 }
 0x1ae   :  { %2428 = vmatprep.subr.bf16.mxu0 %v4450_v59 }
 0x1b0   :  { %2314 = vmatpush1.bf16.msra.mxu1 %v4458_v60 }
 0x1b1   :  { %2315 = vmatprep.subr.bf16.mxu1 %v4464_v61  ;;  %2429 = vmatpush1.bf16.msra.mxu0 %v4458_v60 }
 0x1b2   :  { %2430 = vmatprep.subr.bf16.mxu0 %v4464_v61 }
 0x1b4   :  { %2316 = vmatpush1.bf16.msra.mxu1 %v4472_v62 }
 0x1b5   :  { %2317 = vmatprep.subr.bf16.mxu1 %v4478_v63  ;;  %2431 = vmatpush1.bf16.msra.mxu0 %v4472_v62 }
 0x1b6   :  { %2432 = vmatprep.subr.bf16.mxu0 %v4478_v63 }
 0x1b8   :  { %2318 = vmatpush1.bf16.msra.mxu1 %v4486_v0 }
 0x1b9   :  { %2319 = vmatprep.subr.bf16.mxu1 %v4492_v1  ;;  %2433 = vmatpush1.bf16.msra.mxu0 %v4486_v0 }
 0x1ba   :  { %2434 = vmatprep.subr.bf16.mxu0 %v4492_v1 }
 0x1bc   :  { %2320 = vmatpush1.bf16.msra.mxu1 %v4500_v2 }
 0x1bd   :  { %2321 = vmatprep.subr.bf16.mxu1 %v4506_v3  ;;  %2435 = vmatpush1.bf16.msra.mxu0 %v4500_v2 }
 0x1be   :  { %2436 = vmatprep.subr.bf16.mxu0 %v4506_v3 }
 0x1c0   :  { %2322 = vmatpush1.bf16.msra.mxu1 %v4514_v4 }
 0x1c1   :  { %2348 = vmatprep.subr.bf16.mxu1 %v4520_v5  ;;  %2437 = vmatpush1.bf16.msra.mxu0 %v4514_v4 }
 0x1c2   :  { %2537 = vmatprep.subr.bf16.mxu0 %v4406_v54 }
 0x1c3   :  { %2340 = vmatmul.mubr.bf16.vlgmr.msra.gmra.mrb[40].mxu1 %v4136_v52 }
 0x1c4   :  { %2349 = vmatpush1.bf16.msra.mxu1 %v4528_v6  ;;  %2380 = vmatprep.mubr.bf16.mxu1 %v4136_v52 }
 0x1c5   :  { %2350 = vmatprep.subr.bf16.mxu1 %v4534_v7 }
 0x1c8   :  { %2351 = vmatpush1.bf16.msra.mxu1 %v4543_v8 }
 0x1c9   :  { %2352 = vmatprep.subr.bf16.mxu1 %v4550_v9 }
 0x1cc   :  { %2353 = vmatpush1.bf16.msra.mxu1 %v4556_v10 }
 0x1cd   :  { %2354 = vmatprep.subr.bf16.mxu1 %v4562_v11 }
 0x1d0   :  { %2355 = vmatpush1.bf16.msra.mxu1 %v4568_v12 }
 0x1d1   :  { %2356 = vmatprep.subr.bf16.mxu1 %v4574_v13 }
 0x1d4   :  { %2357 = vmatpush1.bf16.msra.mxu1 %v4580_v14 }
 0x1d5   :  { %2358 = vmatprep.subr.bf16.mxu1 %v4586_v15 }
 0x1d8   :  { %2359 = vmatpush1.bf16.msra.mxu1 %v4592_v16 }
 0x1d9   :  { %2360 = vmatprep.subr.bf16.mxu1 %v4598_v17 }
 0x1dc   :  { %2361 = vmatpush1.bf16.msra.mxu1 %v4604_v19 }
 0x1dd   :  { %2362 = vmatprep.subr.bf16.mxu1 %v4610_v20 }
 0x1e0   :  { %2363 = vmatpush1.bf16.msra.mxu1 %v4616_v21 }
 0x1e1   :  { %2463 = vmatprep.subr.bf16.mxu1 %v4520_v5 }
 0x1e3   :  { %2381 = vmatmul.mubr.bf16.vlgmr.msra.gmra.mrb[8].mxu1 %v4136_v52 }
 0x1e4   :  { %2464 = vmatpush1.bf16.msra.mxu1 %v4528_v6  ;;  %2495 = vmatprep.mubr.bf16.mxu1 %v4136_v52 }
 0x1e5   :  { %2465 = vmatprep.subr.bf16.mxu1 %v4534_v7 }
 0x1e8   :  { %2466 = vmatpush1.bf16.msra.mxu1 %v4543_v8 }
 0x1e9   :  { %2467 = vmatprep.subr.bf16.mxu1 %v4550_v9 }
 0x1ec   :  { %2468 = vmatpush1.bf16.msra.mxu1 %v4556_v10 }
 0x1ed   :  { %2469 = vmatprep.subr.bf16.mxu1 %v4562_v11 }
 0x1f0   :  { %2470 = vmatpush1.bf16.msra.mxu1 %v4568_v12 }
 0x1f1   :  { %2471 = vmatprep.subr.bf16.mxu1 %v4574_v13 }
 0x1f4   :  { %2472 = vmatpush1.bf16.msra.mxu1 %v4580_v14 }
 0x1f5   :  { %2473 = vmatprep.subr.bf16.mxu1 %v4586_v15 }
 0x1f8   :  { %2474 = vmatpush1.bf16.msra.mxu1 %v4592_v16 }
 0x1f9   :  { %2475 = vmatprep.subr.bf16.mxu1 %v4598_v17 }
 0x1fc   :  { %2476 = vmatpush1.bf16.msra.mxu1 %v4604_v19 }
 0x1fd   :  { %2477 = vmatprep.subr.bf16.mxu1 %v4610_v20 }
 0x200   :  { %2478 = vmatpush1.bf16.msra.mxu1 %v4616_v21 }
 0x201   :  { %2578 = vmatprep.subr.bf16.mxu1 %v4520_v5 }
 0x206   :  { %v1467_v22 = vpop.f32.mrb[8].mxu0 }
 0x207   :  { %v1469_v23 = vpop.f32.mrb[9].mxu0  ;;  %v2111_v32 = vadd.f32 %v4644_v30, %v1467_v22 }
 0x208   :  { %v1471_v24 = vpop.f32.mrb[10].mxu0  ;;  %v2112_v33 = vadd.f32 %v4646_v31, %v1469_v23 }
 0x209   :  { %v1472_v25 = vpop.f32.mrb[11].mxu0 }
 0x296   :  { %v2341_v34 = vpop.f32.mrb[40].mxu1 }
 0x297   :  { %v2389_v35 = vadd.f32 %v2341_v34, %v2111_v32  ;;  %v2343_v36 = vpop.f32.mrb[41].mxu1 }
 0x298   :  { %v2390_v37 = vadd.f32 %v2343_v36, %v2112_v33  ;;  %v2345_v38 = vpop.f32.mrb[42].mxu1 }
 0x299   :  { %v2346_v39 = vpop.f32.mrb[43].mxu1  ;;  %v3590_v41 = vmul.f32 -1.442695, %v2389_v35 }
 0x29a   :  { %v3591_v40 = vmul.f32 -1.442695, %v2390_v37 }
 0x29c   :  { %3935 = vpow2.f32 %v3591_v40 }
 0x29d   :  { %3937 = vpow2.f32 %v3590_v41 }
 0x2a6   :  { %v3936_v43 = vpop.eup %3935 }
 0x2a7   :  { %v3938_v46 = vpop.eup %3937  ;;  %v2402_v47 = vadd.f32 1.0, %v3936_v43 }
 0x2a8   :  { %v2396_v49 = vadd.f32 1.0, %v3938_v46 }
 0x2a9   :  { %3939 = vrcp.f32 %v2402_v47 }
 0x2aa   :  { %3941 = vrcp.f32 %v2396_v49 }
 0x2b3   :  { %v3940_v29 = vpop.eup %3939 }
 0x2b4   :  { %v3942_v28 = vpop.eup %3941  ;;  %v2412_v33 = vmul.f32 0.0, %v3940_v29 }
 0x2b6   :  { %v2382_v51 = vpop.f32.mrb[8].mxu1 }
 0x2b7   :  { %v3730_v53 = vadd.f32 %v2382_v51, %v4652_v48  ;;  %v2384_v22 = vpop.f32.mrb[9].mxu1 }
 0x2b8   :  { %v3731_v23 = vadd.f32 %v2384_v22, %v4654_v50  ;;  %v2386_v24 = vpop.f32.mrb[10].mxu1 }
 0x2b9   :  { %3943 = vtanh.f32 %v3730_v53  ;;  %v2387_v25 = vpop.f32.mrb[11].mxu1 }
 0x2ba   :  { %v3592_v26 = vmul.f32 -1.442695, %v3731_v23 }
 0x2bc   :  { %3945 = vpow2.f32 %v3592_v26 }
 0x2c3   :  { %v3944_v32 = vpop.eup %3943 }
 0x2c4   :  { %v2413_v34 = vmul.f32 %v3944_v32, %v3942_v28 }
 0x2c6   :  { %v3946_v27 = vpop.eup %3945  ;;  %v4658_v35 = vadd.f32 %v2413_v34, %v2412_v33 }
 0x2c7   :  { %v2409_v36 = vadd.f32 1.0, %v3946_v27 }
 0x2c8   :  { %3947 = vtanh.f32 %v4658_v35 }
 0x2c9   :  { %3949 = vrcp.f32 %v2409_v36 }
 0x2d2   :  { %v3948_v37 = vpop.eup %3947 }
 0x2d3   :  { %v3950_v38 = vpop.eup %3949 }
 0x2d4   :  { %v2416_v39 = vmul.f32 %v3950_v38, %v3948_v37 }
 0x2d6   :  { %v2421_v40 = vpack.c.bf16 %v2416_v39, %v2416_v39 }
 0x2d8   :  { %2455 = vmatmul.mubr.bf16.vlgmr.msra.gmra.mrb[12].mxu0 %v2421_v40  ;;  %2496 = vmatmul.mubr.bf16.vlgmr.msra.gmra.mrb[12].mxu1 %v2421_v40 }
 0x2d9   :  { %2538 = vmatpush1.bf16.msra.mxu0 %v4411_v55  ;;  %2579 = vmatpush1.bf16.msra.mxu1 %v4528_v6 }
 0x2da   :  { %2539 = vmatprep.subr.bf16.mxu0 %v4417_v56  ;;  %2580 = vmatprep.subr.bf16.mxu1 %v4534_v7 }
 0x2db   :  { %2569 = vmatprep.mubr.bf16.mxu0 %v4136_v52  ;;  %2610 = vmatprep.mubr.bf16.mxu1 %v4136_v52 }
 0x2dd   :  { %2540 = vmatpush1.bf16.msra.mxu0 %v4428_v57  ;;  %2581 = vmatpush1.bf16.msra.mxu1 %v4543_v8 }
 0x2de   :  { %2541 = vmatprep.subr.bf16.mxu0 %v4435_v58  ;;  %2582 = vmatprep.subr.bf16.mxu1 %v4550_v9 }
 0x2e1   :  { %2542 = vmatpush1.bf16.msra.mxu0 %v4444_v18  ;;  %2583 = vmatpush1.bf16.msra.mxu1 %v4556_v10 }
 0x2e2   :  { %2543 = vmatprep.subr.bf16.mxu0 %v4450_v59  ;;  %2584 = vmatprep.subr.bf16.mxu1 %v4562_v11 }
 0x2e5   :  { %2544 = vmatpush1.bf16.msra.mxu0 %v4458_v60  ;;  %2585 = vmatpush1.bf16.msra.mxu1 %v4568_v12 }
 0x2e6   :  { %2545 = vmatprep.subr.bf16.mxu0 %v4464_v61  ;;  %2586 = vmatprep.subr.bf16.mxu1 %v4574_v13 }
 0x2e9   :  { %2546 = vmatpush1.bf16.msra.mxu0 %v4472_v62  ;;  %2587 = vmatpush1.bf16.msra.mxu1 %v4580_v14 }
 0x2ea   :  { %2547 = vmatprep.subr.bf16.mxu0 %v4478_v63  ;;  %2588 = vmatprep.subr.bf16.mxu1 %v4586_v15 }
 0x2ed   :  { %2548 = vmatpush1.bf16.msra.mxu0 %v4486_v0  ;;  %2589 = vmatpush1.bf16.msra.mxu1 %v4592_v16 }
 0x2ee   :  { %2549 = vmatprep.subr.bf16.mxu0 %v4492_v1  ;;  %2590 = vmatprep.subr.bf16.mxu1 %v4598_v17 }
 0x2f1   :  { %2550 = vmatpush1.bf16.msra.mxu0 %v4500_v2  ;;  %2591 = vmatpush1.bf16.msra.mxu1 %v4604_v19 }
 0x2f2   :  { %2551 = vmatprep.subr.bf16.mxu0 %v4506_v3  ;;  %2592 = vmatprep.subr.bf16.mxu1 %v4610_v20 }
 0x2f5   :  { %2552 = vmatpush1.bf16.msra.mxu0 %v4514_v4  ;;  %2593 = vmatpush1.bf16.msra.mxu1 %v4616_v21 }
 0x2f6   :  { %2652 = vmatprep.subr.bf16.mxu0 %v4406_v54  ;;  %2693 = vmatprep.subr.bf16.mxu1 %v4520_v5 }
 0x3ab   :  { %v2456_v41 = vpop.f32.mrb[12].mxu0  ;;  %v2497_v42 = vpop.f32.mrb[12].mxu1 }
 0x3ac   :  { %v3732_v43 = vadd.f32 %v2456_v41, %v4644_v30  ;;  %v2458_v44 = vpop.f32.mrb[13].mxu0  ;;  %v2499_v46 = vpop.f32.mrb[13].mxu1  ;;  %v3734_v29 = vadd.f32 %v2497_v42, %v4652_v48 }
 0x3ad   :  { %v3733_v47 = vadd.f32 %v2458_v44, %v4646_v31  ;;  %v2460_v49 = vpop.f32.mrb[14].mxu0  ;;  %v2501_v51 = vpop.f32.mrb[14].mxu1  ;;  %v3735_v25 = vadd.f32 %v2499_v46, %v4654_v50 }
 0x3ae   :  { %v3593_v53 = vmul.f32 -1.442695, %v3732_v43  ;;  %v2461_v22 = vpop.f32.mrb[15].mxu0  ;;  %v2502_v23 = vpop.f32.mrb[15].mxu1 }
 0x3af   :  { %v3594_v24 = vmul.f32 -1.442695, %v3733_v47  ;;  %v3595_v26 = vmul.f32 -1.442695, %v3735_v25 }
 0x3b0   :  { %3951 = vpow2.f32 %v3593_v53 }
 0x3b1   :  { %3953 = vpow2.f32 %v3594_v24 }
 0x3b2   :  { %3955 = vpow2.f32 %v3595_v26 }
 0x3b3   :  { %3957 = vtanh.f32 %v3734_v29 }
 0x3ba   :  { %v3952_v28 = vpop.eup %3951 }
 0x3bb   :  { %v3954_v32 = vpop.eup %3953  ;;  %v2511_v33 = vadd.f32 1.0, %v3952_v28 }
 0x3bc   :  { %v2517_v34 = vadd.f32 1.0, %v3954_v32  ;;  %v3956_v27 = vpop.eup %3955 }
 0x3bd   :  { %3959 = vrcp.f32 %v2511_v33  ;;  %v3958_v36 = vpop.eup %3957  ;;  %v2524_v40 = vadd.f32 1.0, %v3956_v27 }
 0x3be   :  { %3961 = vrcp.f32 %v2517_v34 }
 0x3bf   :  { %3963 = vrcp.f32 %v2524_v40 }
 0x3c7   :  { %v3960_v37 = vpop.eup %3959 }
 0x3c8   :  { %v3962_v38 = vpop.eup %3961  ;;  %v2528_v39 = vmul.f32 %v3960_v37, %v3958_v36 }
 0x3c9   :  { %v2527_v41 = vmul.f32 %v3962_v38, %v4658_v35  ;;  %v3964_v42 = vpop.eup %3963 }
 0x3cb   :  { %v4700_v43 = vadd.f32 %v2528_v39, %v2527_v41 }
 0x3cd   :  { %3965 = vtanh.f32 %v4700_v43 }
 0x3d7   :  { %v3966_v44 = vpop.eup %3965 }
 0x3d8   :  { %v2531_v46 = vmul.f32 %v3966_v44, %v3964_v42 }
 0x3da   :  { %v2536_v47 = vpack.c.bf16 %v2531_v46, %v2531_v46 }
 0x3dc   :  { %2570 = vmatmul.mubr.bf16.vlgmr.msra.gmra.mrb[16].mxu0 %v2536_v47  ;;  %2611 = vmatmul.mubr.bf16.vlgmr.msra.gmra.mrb[16].mxu1 %v2536_v47 }
 0x3dd   :  { %2653 = vmatpush1.bf16.msra.mxu0 %v4411_v55  ;;  %2694 = vmatpush1.bf16.msra.mxu1 %v4528_v6 }
 0x3de   :  { %2654 = vmatprep.subr.bf16.mxu0 %v4417_v56  ;;  %2695 = vmatprep.subr.bf16.mxu1 %v4534_v7 }
 0x3df   :  { %2684 = vmatprep.mubr.bf16.mxu0 %v4136_v52  ;;  %2725 = vmatprep.mubr.bf16.mxu1 %v4136_v52 }
 0x3e1   :  { %2655 = vmatpush1.bf16.msra.mxu0 %v4428_v57  ;;  %2696 = vmatpush1.bf16.msra.mxu1 %v4543_v8 }
 0x3e2   :  { %2656 = vmatprep.subr.bf16.mxu0 %v4435_v58  ;;  %2697 = vmatprep.subr.bf16.mxu1 %v4550_v9 }
 0x3e5   :  { %2657 = vmatpush1.bf16.msra.mxu0 %v4444_v18  ;;  %2698 = vmatpush1.bf16.msra.mxu1 %v4556_v10 }
 0x3e6   :  { %2658 = vmatprep.subr.bf16.mxu0 %v4450_v59  ;;  %2699 = vmatprep.subr.bf16.mxu1 %v4562_v11 }
 0x3e9   :  { %2659 = vmatpush1.bf16.msra.mxu0 %v4458_v60  ;;  %2700 = vmatpush1.bf16.msra.mxu1 %v4568_v12 }
 0x3ea   :  { %2660 = vmatprep.subr.bf16.mxu0 %v4464_v61  ;;  %2701 = vmatprep.subr.bf16.mxu1 %v4574_v13 }
 0x3ed   :  { %2661 = vmatpush1.bf16.msra.mxu0 %v4472_v62  ;;  %2702 = vmatpush1.bf16.msra.mxu1 %v4580_v14 }
 0x3ee   :  { %2662 = vmatprep.subr.bf16.mxu0 %v4478_v63  ;;  %2703 = vmatprep.subr.bf16.mxu1 %v4586_v15 }
 0x3f1   :  { %2663 = vmatpush1.bf16.msra.mxu0 %v4486_v0  ;;  %2704 = vmatpush1.bf16.msra.mxu1 %v4592_v16 }
 0x3f2   :  { %2664 = vmatprep.subr.bf16.mxu0 %v4492_v1  ;;  %2705 = vmatprep.subr.bf16.mxu1 %v4598_v17 }
 0x3f5   :  { %2665 = vmatpush1.bf16.msra.mxu0 %v4500_v2  ;;  %2706 = vmatpush1.bf16.msra.mxu1 %v4604_v19 }
 0x3f6   :  { %2666 = vmatprep.subr.bf16.mxu0 %v4506_v3  ;;  %2707 = vmatprep.subr.bf16.mxu1 %v4610_v20 }
 0x3f9   :  { %2667 = vmatpush1.bf16.msra.mxu0 %v4514_v4  ;;  %2708 = vmatpush1.bf16.msra.mxu1 %v4616_v21 }
 0x3fa   :  { %2767 = vmatprep.subr.bf16.mxu0 %v4406_v54  ;;  %2808 = vmatprep.subr.bf16.mxu1 %v4520_v5 }
 0x4af   :  { %v2571_v35 = vpop.f32.mrb[16].mxu0  ;;  %v2612_v49 = vpop.f32.mrb[16].mxu1 }
 0x4b0   :  { %v3736_v51 = vadd.f32 %v2571_v35, %v4644_v30  ;;  %v2573_v53 = vpop.f32.mrb[17].mxu0  ;;  %v2614_v22 = vpop.f32.mrb[17].mxu1  ;;  %v3738_v27 = vadd.f32 %v2612_v49, %v4652_v48 }
 0x4b1   :  { %v3737_v23 = vadd.f32 %v2573_v53, %v4646_v31  ;;  %v2575_v24 = vpop.f32.mrb[18].mxu0  ;;  %v2616_v25 = vpop.f32.mrb[18].mxu1  ;;  %v3739_v33 = vadd.f32 %v2614_v22, %v4654_v50 }
 0x4b2   :  { %v3596_v26 = vmul.f32 -1.442695, %v3736_v51  ;;  %v2576_v29 = vpop.f32.mrb[19].mxu0  ;;  %v2617_v28 = vpop.f32.mrb[19].mxu1 }
 0x4b3   :  { %v3597_v32 = vmul.f32 -1.442695, %v3737_v23  ;;  %v3598_v34 = vmul.f32 -1.442695, %v3739_v33 }
 0x4b4   :  { %3967 = vpow2.f32 %v3596_v26 }
 0x4b5   :  { %3969 = vpow2.f32 %v3597_v32 }
 0x4b6   :  { %3971 = vpow2.f32 %v3598_v34 }
 0x4b7   :  { %3973 = vtanh.f32 %v3738_v27 }
 0x4be   :  { %v3968_v36 = vpop.eup %3967 }
 0x4bf   :  { %v3970_v37 = vpop.eup %3969  ;;  %v2626_v38 = vadd.f32 1.0, %v3968_v36 }
 0x4c0   :  { %v2632_v39 = vadd.f32 1.0, %v3970_v37  ;;  %v3972_v40 = vpop.eup %3971 }
 0x4c1   :  { %3975 = vrcp.f32 %v2626_v38  ;;  %v3974_v41 = vpop.eup %3973  ;;  %v2639_v47 = vadd.f32 1.0, %v3972_v40 }
 0x4c2   :  { %3977 = vrcp.f32 %v2632_v39 }
 0x4c3   :  { %3979 = vrcp.f32 %v2639_v47 }
 0x4cb   :  { %v3976_v42 = vpop.eup %3975 }
 0x4cc   :  { %v3978_v44 = vpop.eup %3977  ;;  %v2643_v46 = vmul.f32 %v3976_v42, %v3974_v41 }
 0x4cd   :  { %v2642_v35 = vmul.f32 %v3978_v44, %v4700_v43  ;;  %v3980_v49 = vpop.eup %3979 }
 0x4cf   :  { %v4742_v51 = vadd.f32 %v2643_v46, %v2642_v35 }
 0x4d1   :  { %3981 = vtanh.f32 %v4742_v51 }
 0x4db   :  { %v3982_v53 = vpop.eup %3981 }
 0x4dc   :  { %v2646_v22 = vmul.f32 %v3982_v53, %v3980_v49 }
 0x4de   :  { %v2651_v23 = vpack.c.bf16 %v2646_v22, %v2646_v22 }
 0x4e0   :  { %2685 = vmatmul.mubr.bf16.vlgmr.msra.gmra.mrb[20].mxu0 %v2651_v23  ;;  %2726 = vmatmul.mubr.bf16.vlgmr.msra.gmra.mrb[20].mxu1 %v2651_v23 }
 0x4e1   :  { %2768 = vmatpush1.bf16.msra.mxu0 %v4411_v55  ;;  %2809 = vmatpush1.bf16.msra.mxu1 %v4528_v6 }
 0x4e2   :  { %2769 = vmatprep.subr.bf16.mxu0 %v4417_v56  ;;  %2810 = vmatprep.subr.bf16.mxu1 %v4534_v7 }
 0x4e3   :  { %2799 = vmatprep.mubr.bf16.mxu0 %v4136_v52  ;;  %2840 = vmatprep.mubr.bf16.mxu1 %v4136_v52 }
 0x4e5   :  { %2770 = vmatpush1.bf16.msra.mxu0 %v4428_v57  ;;  %2811 = vmatpush1.bf16.msra.mxu1 %v4543_v8 }
 0x4e6   :  { %2771 = vmatprep.subr.bf16.mxu0 %v4435_v58  ;;  %2812 = vmatprep.subr.bf16.mxu1 %v4550_v9 }
 0x4e9   :  { %2772 = vmatpush1.bf16.msra.mxu0 %v4444_v18  ;;  %2813 = vmatpush1.bf16.msra.mxu1 %v4556_v10 }
 0x4ea   :  { %2773 = vmatprep.subr.bf16.mxu0 %v4450_v59  ;;  %2814 = vmatprep.subr.bf16.mxu1 %v4562_v11 }
 0x4ed   :  { %2774 = vmatpush1.bf16.msra.mxu0 %v4458_v60  ;;  %2815 = vmatpush1.bf16.msra.mxu1 %v4568_v12 }
 0x4ee   :  { %2775 = vmatprep.subr.bf16.mxu0 %v4464_v61  ;;  %2816 = vmatprep.subr.bf16.mxu1 %v4574_v13 }
 0x4f1   :  { %2776 = vmatpush1.bf16.msra.mxu0 %v4472_v62  ;;  %2817 = vmatpush1.bf16.msra.mxu1 %v4580_v14 }
 0x4f2   :  { %2777 = vmatprep.subr.bf16.mxu0 %v4478_v63  ;;  %2818 = vmatprep.subr.bf16.mxu1 %v4586_v15 }
 0x4f5   :  { %2778 = vmatpush1.bf16.msra.mxu0 %v4486_v0  ;;  %2819 = vmatpush1.bf16.msra.mxu1 %v4592_v16 }
 0x4f6   :  { %2779 = vmatprep.subr.bf16.mxu0 %v4492_v1  ;;  %2820 = vmatprep.subr.bf16.mxu1 %v4598_v17 }
 0x4f9   :  { %2780 = vmatpush1.bf16.msra.mxu0 %v4500_v2  ;;  %2821 = vmatpush1.bf16.msra.mxu1 %v4604_v19 }
 0x4fa   :  { %2781 = vmatprep.subr.bf16.mxu0 %v4506_v3  ;;  %2822 = vmatprep.subr.bf16.mxu1 %v4610_v20 }
 0x4fd   :  { %2782 = vmatpush1.bf16.msra.mxu0 %v4514_v4  ;;  %2823 = vmatpush1.bf16.msra.mxu1 %v4616_v21 }
 0x4fe   :  { %2882 = vmatprep.subr.bf16.mxu0 %v4406_v54  ;;  %2923 = vmatprep.subr.bf16.mxu1 %v4520_v5 }
 0x5b3   :  { %v2686_v43 = vpop.f32.mrb[20].mxu0  ;;  %v2727_v24 = vpop.f32.mrb[20].mxu1 }
 0x5b4   :  { %v3740_v25 = vadd.f32 %v2686_v43, %v4644_v30  ;;  %v2688_v26 = vpop.f32.mrb[21].mxu0  ;;  %v2729_v29 = vpop.f32.mrb[21].mxu1  ;;  %v3742_v40 = vadd.f32 %v2727_v24, %v4652_v48 }
 0x5b5   :  { %v3741_v28 = vadd.f32 %v2688_v26, %v4646_v31  ;;  %v2690_v32 = vpop.f32.mrb[22].mxu0  ;;  %v2731_v33 = vpop.f32.mrb[22].mxu1  ;;  %v3743_v38 = vadd.f32 %v2729_v29, %v4654_v50 }
 0x5b6   :  { %v3599_v34 = vmul.f32 -1.442695, %v3740_v25  ;;  %v2691_v27 = vpop.f32.mrb[23].mxu0  ;;  %v2732_v36 = vpop.f32.mrb[23].mxu1 }
 0x5b7   :  { %v3600_v37 = vmul.f32 -1.442695, %v3741_v28  ;;  %v3601_v39 = vmul.f32 -1.442695, %v3743_v38 }
 0x5b8   :  { %3983 = vpow2.f32 %v3599_v34 }
 0x5b9   :  { %3985 = vpow2.f32 %v3600_v37 }
 0x5ba   :  { %3987 = vpow2.f32 %v3601_v39 }
 0x5bb   :  { %3989 = vtanh.f32 %v3742_v40 }
 0x5c2   :  { %v3984_v41 = vpop.eup %3983 }
 0x5c3   :  { %v3986_v42 = vpop.eup %3985  ;;  %v2741_v44 = vadd.f32 1.0, %v3984_v41 }
 0x5c4   :  { %v2747_v46 = vadd.f32 1.0, %v3986_v42  ;;  %v3988_v47 = vpop.eup %3987 }
 0x5c5   :  { %3991 = vrcp.f32 %v2741_v44  ;;  %v3990_v35 = vpop.eup %3989  ;;  %v2754_v23 = vadd.f32 1.0, %v3988_v47 }
 0x5c6   :  { %3993 = vrcp.f32 %v2747_v46 }
 0x5c7   :  { %3995 = vrcp.f32 %v2754_v23 }
 0x5cf   :  { %v3992_v49 = vpop.eup %3991 }
 0x5d0   :  { %v3994_v53 = vpop.eup %3993  ;;  %v2758_v22 = vmul.f32 %v3992_v49, %v3990_v35 }
 0x5d1   :  { %v2757_v43 = vmul.f32 %v3994_v53, %v4742_v51  ;;  %v3996_v24 = vpop.eup %3995 }
 0x5d3   :  { %v4784_v25 = vadd.f32 %v2758_v22, %v2757_v43 }
 0x5d5   :  { %3997 = vtanh.f32 %v4784_v25 }
 0x5df   :  { %v3998_v26 = vpop.eup %3997 }
 0x5e0   :  { %v2761_v29 = vmul.f32 %v3998_v26, %v3996_v24 }
 0x5e2   :  { %v2766_v28 = vpack.c.bf16 %v2761_v29, %v2761_v29 }
 0x5e4   :  { %2800 = vmatmul.mubr.bf16.vlgmr.msra.gmra.mrb[24].mxu0 %v2766_v28  ;;  %2841 = vmatmul.mubr.bf16.vlgmr.msra.gmra.mrb[24].mxu1 %v2766_v28 }
 0x5e5   :  { %2883 = vmatpush1.bf16.msra.mxu0 %v4411_v55  ;;  %2924 = vmatpush1.bf16.msra.mxu1 %v4528_v6 }
 0x5e6   :  { %2884 = vmatprep.subr.bf16.mxu0 %v4417_v56  ;;  %2925 = vmatprep.subr.bf16.mxu1 %v4534_v7 }
 0x5e7   :  { %2914 = vmatprep.mubr.bf16.mxu0 %v4136_v52  ;;  %2955 = vmatprep.mubr.bf16.mxu1 %v4136_v52 }
 0x5e9   :  { %2885 = vmatpush1.bf16.msra.mxu0 %v4428_v57  ;;  %2926 = vmatpush1.bf16.msra.mxu1 %v4543_v8 }
 0x5ea   :  { %2886 = vmatprep.subr.bf16.mxu0 %v4435_v58  ;;  %2927 = vmatprep.subr.bf16.mxu1 %v4550_v9 }
 0x5ed   :  { %2887 = vmatpush1.bf16.msra.mxu0 %v4444_v18  ;;  %2928 = vmatpush1.bf16.msra.mxu1 %v4556_v10 }
 0x5ee   :  { %2888 = vmatprep.subr.bf16.mxu0 %v4450_v59  ;;  %2929 = vmatprep.subr.bf16.mxu1 %v4562_v11 }
 0x5f1   :  { %2889 = vmatpush1.bf16.msra.mxu0 %v4458_v60  ;;  %2930 = vmatpush1.bf16.msra.mxu1 %v4568_v12 }
 0x5f2   :  { %2890 = vmatprep.subr.bf16.mxu0 %v4464_v61  ;;  %2931 = vmatprep.subr.bf16.mxu1 %v4574_v13 }
 0x5f5   :  { %2891 = vmatpush1.bf16.msra.mxu0 %v4472_v62  ;;  %2932 = vmatpush1.bf16.msra.mxu1 %v4580_v14 }
 0x5f6   :  { %2892 = vmatprep.subr.bf16.mxu0 %v4478_v63  ;;  %2933 = vmatprep.subr.bf16.mxu1 %v4586_v15 }
 0x5f9   :  { %2893 = vmatpush1.bf16.msra.mxu0 %v4486_v0  ;;  %2934 = vmatpush1.bf16.msra.mxu1 %v4592_v16 }
 0x5fa   :  { %2894 = vmatprep.subr.bf16.mxu0 %v4492_v1  ;;  %2935 = vmatprep.subr.bf16.mxu1 %v4598_v17 }
 0x5fd   :  { %2895 = vmatpush1.bf16.msra.mxu0 %v4500_v2  ;;  %2936 = vmatpush1.bf16.msra.mxu1 %v4604_v19 }
 0x5fe   :  { %2896 = vmatprep.subr.bf16.mxu0 %v4506_v3  ;;  %2937 = vmatprep.subr.bf16.mxu1 %v4610_v20 }
 0x601   :  { %2897 = vmatpush1.bf16.msra.mxu0 %v4514_v4  ;;  %2938 = vmatpush1.bf16.msra.mxu1 %v4616_v21 }
 0x602   :  { %2997 = vmatprep.subr.bf16.mxu0 %v4406_v54  ;;  %3038 = vmatprep.subr.bf16.mxu1 %v4520_v5 }
 0x6b7   :  { %v2801_v51 = vpop.f32.mrb[24].mxu0  ;;  %v2842_v32 = vpop.f32.mrb[24].mxu1 }
 0x6b8   :  { %v3744_v33 = vadd.f32 %v2801_v51, %v4644_v30  ;;  %v2803_v34 = vpop.f32.mrb[25].mxu0  ;;  %v2844_v27 = vpop.f32.mrb[25].mxu1  ;;  %v3746_v47 = vadd.f32 %v2842_v32, %v4652_v48 }
 0x6b9   :  { %v3745_v36 = vadd.f32 %v2803_v34, %v4646_v31  ;;  %v2805_v37 = vpop.f32.mrb[26].mxu0  ;;  %v2846_v38 = vpop.f32.mrb[26].mxu1  ;;  %v3747_v44 = vadd.f32 %v2844_v27, %v4654_v50 }
 0x6ba   :  { %v3602_v39 = vmul.f32 -1.442695, %v3744_v33  ;;  %v2806_v40 = vpop.f32.mrb[27].mxu0  ;;  %v2847_v41 = vpop.f32.mrb[27].mxu1 }
 0x6bb   :  { %v3603_v42 = vmul.f32 -1.442695, %v3745_v36  ;;  %v3604_v46 = vmul.f32 -1.442695, %v3747_v44 }
 0x6bc   :  { %3999 = vpow2.f32 %v3602_v39 }
 0x6bd   :  { %4001 = vpow2.f32 %v3603_v42 }
 0x6be   :  { %4003 = vpow2.f32 %v3604_v46 }
 0x6bf   :  { %4005 = vtanh.f32 %v3746_v47 }
 0x6c6   :  { %v4000_v35 = vpop.eup %3999 }
 0x6c7   :  { %v4002_v49 = vpop.eup %4001  ;;  %v2856_v53 = vadd.f32 1.0, %v4000_v35 }
 0x6c8   :  { %v2862_v22 = vadd.f32 1.0, %v4002_v49  ;;  %v4004_v23 = vpop.eup %4003 }
 0x6c9   :  { %4007 = vrcp.f32 %v2856_v53  ;;  %v4006_v43 = vpop.eup %4005  ;;  %v2869_v28 = vadd.f32 1.0, %v4004_v23  ;;  %v4067_v23 = vld [vmem:[%s5002_s4] ss:$16 sps:$4 sm:$0xff]  }
 0x6ca   :  { %4009 = vrcp.f32 %v2862_v22 }
 0x6cb   :  { %4011 = vrcp.f32 %v2869_v28 }
 0x6d3   :  { %v4008_v24 = vpop.eup %4007 }
 0x6d4   :  { %v4010_v26 = vpop.eup %4009  ;;  %v2873_v29 = vmul.f32 %v4008_v24, %v4006_v43  ;;  %v4068_v43 = vld [vmem:[%s5002_s4 + $0x24] ss:$16 sps:$4 sm:$0xff]   ;;  %v4069_v24 = vld [vmem:[%s5002_s4 + $0x20] ss:$16 sps:$4 sm:$0xff]  }
 0x6d5   :  { %v2872_v51 = vmul.f32 %v4010_v26, %v4784_v25  ;;  %v4012_v32 = vpop.eup %4011 }
 0x6d7   :  { %v4826_v33 = vadd.f32 %v2873_v29, %v2872_v51 }
 0x6d9   :  { %4013 = vtanh.f32 %v4826_v33 }
 0x6e3   :  { %v4014_v34 = vpop.eup %4013 }
 0x6e4   :  { %v2876_v27 = vmul.f32 %v4014_v34, %v4012_v32 }
 0x6e6   :  { %v2881_v36 = vpack.c.bf16 %v2876_v27, %v2876_v27 }
 0x6e8   :  { %2915 = vmatmul.mubr.bf16.vlgmr.msra.gmra.mrb[28].mxu0 %v2881_v36  ;;  %2956 = vmatmul.mubr.bf16.vlgmr.msra.gmra.mrb[28].mxu1 %v2881_v36 }
 0x6e9   :  { %2998 = vmatpush1.bf16.msra.mxu0 %v4411_v55  ;;  %3039 = vmatpush1.bf16.msra.mxu1 %v4528_v6 }
 0x6ea   :  { %2999 = vmatprep.subr.bf16.mxu0 %v4417_v56  ;;  %3040 = vmatprep.subr.bf16.mxu1 %v4534_v7 }
 0x6eb   :  { %3029 = vmatprep.mubr.bf16.mxu0 %v4136_v52  ;;  %3070 = vmatprep.mubr.bf16.mxu1 %v4136_v52 }
 0x6ed   :  { %3000 = vmatpush1.bf16.msra.mxu0 %v4428_v57  ;;  %3041 = vmatpush1.bf16.msra.mxu1 %v4543_v8 }
 0x6ee   :  { %3001 = vmatprep.subr.bf16.mxu0 %v4435_v58  ;;  %3042 = vmatprep.subr.bf16.mxu1 %v4550_v9 }
 0x6f1   :  { %3002 = vmatpush1.bf16.msra.mxu0 %v4444_v18  ;;  %3043 = vmatpush1.bf16.msra.mxu1 %v4556_v10 }
 0x6f2   :  { %3003 = vmatprep.subr.bf16.mxu0 %v4450_v59  ;;  %3044 = vmatprep.subr.bf16.mxu1 %v4562_v11 }
 0x6f5   :  { %3004 = vmatpush1.bf16.msra.mxu0 %v4458_v60  ;;  %3045 = vmatpush1.bf16.msra.mxu1 %v4568_v12 }
 0x6f6   :  { %3005 = vmatprep.subr.bf16.mxu0 %v4464_v61  ;;  %3046 = vmatprep.subr.bf16.mxu1 %v4574_v13 }
 0x6f9   :  { %3006 = vmatpush1.bf16.msra.mxu0 %v4472_v62  ;;  %3047 = vmatpush1.bf16.msra.mxu1 %v4580_v14 }
 0x6fa   :  { %3007 = vmatprep.subr.bf16.mxu0 %v4478_v63  ;;  %3048 = vmatprep.subr.bf16.mxu1 %v4586_v15 }
 0x6fd   :  { %3008 = vmatpush1.bf16.msra.mxu0 %v4486_v0  ;;  %3049 = vmatpush1.bf16.msra.mxu1 %v4592_v16 }
 0x6fe   :  { %3009 = vmatprep.subr.bf16.mxu0 %v4492_v1  ;;  %3050 = vmatprep.subr.bf16.mxu1 %v4598_v17 }
 0x701   :  { %3010 = vmatpush1.bf16.msra.mxu0 %v4500_v2  ;;  %3051 = vmatpush1.bf16.msra.mxu1 %v4604_v19 }
 0x702   :  { %3011 = vmatprep.subr.bf16.mxu0 %v4506_v3  ;;  %3052 = vmatprep.subr.bf16.mxu1 %v4610_v20 }
 0x705   :  { %3012 = vmatpush1.bf16.msra.mxu0 %v4514_v4  ;;  %3053 = vmatpush1.bf16.msra.mxu1 %v4616_v21 }
 0x706   :  { %3112 = vmatprep.subr.bf16.mxu0 %v4406_v54  ;;  %3153 = vmatprep.subr.bf16.mxu1 %v4520_v5 }
 0x7bb   :  { %v2916_v55 = vpop.f32.mrb[28].mxu0  ;;  %v2957_v56 = vpop.f32.mrb[28].mxu1 }
 0x7bc   :  { %v3748_v57 = vadd.f32 %v2916_v55, %v4644_v30  ;;  %v2918_v58 = vpop.f32.mrb[29].mxu0  ;;  %v2959_v18 = vpop.f32.mrb[29].mxu1  ;;  %v3750_v3 = vadd.f32 %v2957_v56, %v4652_v48 }
 0x7bd   :  { %v3749_v59 = vadd.f32 %v2918_v58, %v4646_v31  ;;  %v2920_v60 = vpop.f32.mrb[30].mxu0  ;;  %v2961_v61 = vpop.f32.mrb[30].mxu1  ;;  %v3751_v54 = vadd.f32 %v2959_v18, %v4654_v50 }
 0x7be   :  { %v3605_v62 = vmul.f32 -1.442695, %v3748_v57  ;;  %v2921_v63 = vpop.f32.mrb[31].mxu0  ;;  %v2962_v0 = vpop.f32.mrb[31].mxu1 }
 0x7bf   :  { %v3606_v1 = vmul.f32 -1.442695, %v3749_v59  ;;  %v3607_v2 = vmul.f32 -1.442695, %v3751_v54 }
 0x7c0   :  { %4015 = vpow2.f32 %v3605_v62 }
 0x7c1   :  { %4017 = vpow2.f32 %v3606_v1 }
 0x7c2   :  { %4019 = vpow2.f32 %v3607_v2 }
 0x7c3   :  { %4021 = vtanh.f32 %v3750_v3 }
 0x7ca   :  { %v4016_v4 = vpop.eup %4015 }
 0x7cb   :  { %v4018_v5 = vpop.eup %4017  ;;  %v2971_v25 = vadd.f32 1.0, %v4016_v4 }
 0x7cc   :  { %v2977_v37 = vadd.f32 1.0, %v4018_v5  ;;  %v4020_v38 = vpop.eup %4019 }
 0x7cd   :  { %4023 = vrcp.f32 %v2971_v25  ;;  %v4022_v39 = vpop.eup %4021  ;;  %v2984_v44 = vadd.f32 1.0, %v4020_v38  ;;  %v3928_v38 = vld [vmem:[%s5004_s6 + $0x8] sm:$0xff]  }
 0x7ce   :  { %4025 = vrcp.f32 %v2977_v37  ;;  %v3927_v37 = vld [vmem:[%s5004_s6] sm:$0xff]  }
 0x7cf   :  { %4027 = vrcp.f32 %v2984_v44  ;;  %v3933_v44 = vld [vmem:[%s5004_s6 + $0x30] sm:$0xff]  }
 0x7d7   :  { %v4024_v40 = vpop.eup %4023 }
 0x7d8   :  { %v4026_v41 = vpop.eup %4025  ;;  %v2988_v42 = vmul.f32 %v4024_v40, %v4022_v39  ;;  %v3929_v39 = vld [vmem:[%s5004_s6 + $0x10] sm:$0xff]   ;;  %v3930_v40 = vld [vmem:[%s5004_s6 + $0x18] sm:$0xff]  }
 0x7d9   :  { %v2987_v46 = vmul.f32 %v4026_v41, %v4826_v33  ;;  %v4028_v35 = vpop.eup %4027  ;;  %v3931_v41 = vld [vmem:[%s5004_s6 + $0x20] sm:$0xff]  }
 0x7db   :  { %v4868_v47 = vadd.f32 %v2988_v42, %v2987_v46  ;;  %v3932_v42 = vld [vmem:[%s5004_s6 + $0x28] sm:$0xff]   ;;  %v3934_v46 = vld [vmem:[%s5004_s6 + $0x38] sm:$0xff]  }
 0x7dd   :  { %4029 = vtanh.f32 %v4868_v47 }
 0x7e7   :  { %v4030_v49 = vpop.eup %4029 }
 0x7e8   :  { %v2991_v53 = vmul.f32 %v4030_v49, %v4028_v35 }
 0x7ea   :  { %v2996_v22 = vpack.c.bf16 %v2991_v53, %v2991_v53 }
 0x7ec   :  { %3030 = vmatmul.mubr.bf16.vlgmr.msra.gmra.mrb[32].mxu0 %v2996_v22  ;;  %3071 = vmatmul.mubr.bf16.vlgmr.msra.gmra.mrb[32].mxu1 %v2996_v22 }
 0x7ed   :  { %3113 = vmatpush1.bf16.msra.mxu0 %v4067_v23  ;;  %3154 = vmatpush1.bf16.msra.mxu1 %v4528_v6  ;;  %v4070_v6 = vld [vmem:[%s5002_s4 + $0x44] ss:$16 sps:$4 sm:$0xff]  }
 0x7ee   :  { %3114 = vmatprep.subr.bf16.mxu0 %v4068_v43  ;;  %3155 = vmatprep.subr.bf16.mxu1 %v4534_v7  ;;  %v4071_v7 = vld [vmem:[%s5002_s4 + $0x40] ss:$16 sps:$4 sm:$0xff]  }
 0x7ef   :  { %3144 = vmatprep.mubr.bf16.mxu0 %v4136_v52  ;;  %3185 = vmatprep.mubr.bf16.mxu1 %v4136_v52  ;;  %v4072_v52 = vld [vmem:[%s5002_s4 + $0x64] ss:$16 sps:$4 sm:$0xff]  }
 0x7f1   :  { %3115 = vmatpush1.bf16.msra.mxu0 %v4069_v24  ;;  %3156 = vmatpush1.bf16.msra.mxu1 %v4543_v8  ;;  %v4073_v8 = vld [vmem:[%s5002_s4 + $0x60] ss:$16 sps:$4 sm:$0xff]  }
 0x7f2   :  { %3116 = vmatprep.subr.bf16.mxu0 %v4070_v6  ;;  %3157 = vmatprep.subr.bf16.mxu1 %v4550_v9  ;;  %v4074_v9 = vld [vmem:[%s5002_s4 + $0x84] ss:$16 sps:$4 sm:$0xff]  }
 0x7f5   :  { %3117 = vmatpush1.bf16.msra.mxu0 %v4071_v7  ;;  %3158 = vmatpush1.bf16.msra.mxu1 %v4556_v10  ;;  %v4075_v10 = vld [vmem:[%s5002_s4 + $0x80] ss:$16 sps:$4 sm:$0xff]  }
 0x7f6   :  { %3118 = vmatprep.subr.bf16.mxu0 %v4072_v52  ;;  %3159 = vmatprep.subr.bf16.mxu1 %v4562_v11  ;;  %v4076_v11 = vld [vmem:[%s5002_s4 + $0xa4] ss:$16 sps:$4 sm:$0xff]  }
 0x7f9   :  { %3119 = vmatpush1.bf16.msra.mxu0 %v4073_v8  ;;  %3160 = vmatpush1.bf16.msra.mxu1 %v4568_v12  ;;  %v4077_v12 = vld [vmem:[%s5002_s4 + $0xa0] ss:$16 sps:$4 sm:$0xff]  }
 0x7fa   :  { %3120 = vmatprep.subr.bf16.mxu0 %v4074_v9  ;;  %3161 = vmatprep.subr.bf16.mxu1 %v4574_v13  ;;  %v4078_v13 = vld [vmem:[%s5002_s4 + $0xc4] ss:$16 sps:$4 sm:$0xff]  }
 0x7fd   :  { %3121 = vmatpush1.bf16.msra.mxu0 %v4075_v10  ;;  %3162 = vmatpush1.bf16.msra.mxu1 %v4580_v14  ;;  %v4079_v14 = vld [vmem:[%s5002_s4 + $0xc0] ss:$16 sps:$4 sm:$0xff]  }
 0x7fe   :  { %3122 = vmatprep.subr.bf16.mxu0 %v4076_v11  ;;  %3163 = vmatprep.subr.bf16.mxu1 %v4586_v15  ;;  %v4080_v15 = vld [vmem:[%s5002_s4 + $0xe4] ss:$16 sps:$4 sm:$0xff]  }
 0x801   :  { %3123 = vmatpush1.bf16.msra.mxu0 %v4077_v12  ;;  %3164 = vmatpush1.bf16.msra.mxu1 %v4592_v16  ;;  %v4081_v16 = vld [vmem:[%s5002_s4 + $0xe0] ss:$16 sps:$4 sm:$0xff]  }
 0x802   :  { %3124 = vmatprep.subr.bf16.mxu0 %v4078_v13  ;;  %3165 = vmatprep.subr.bf16.mxu1 %v4598_v17 }
 0x805   :  { %3125 = vmatpush1.bf16.msra.mxu0 %v4079_v14  ;;  %3166 = vmatpush1.bf16.msra.mxu1 %v4604_v19 }
 0x806   :  { %3126 = vmatprep.subr.bf16.mxu0 %v4080_v15  ;;  %3167 = vmatprep.subr.bf16.mxu1 %v4610_v20 }
 0x809   :  { %3127 = vmatpush1.bf16.msra.mxu0 %v4081_v16  ;;  %3168 = vmatpush1.bf16.msra.mxu1 %v4616_v21 }
 0x80a   :  { %3706 = vmatprep.subr.bf16.mxu0 %v4134_v45 }
 0x8bf   :  { %v3031_v17 = vpop.f32.mrb[32].mxu0  ;;  %v3072_v26 = vpop.f32.mrb[32].mxu1 }
 0x8c0   :  { %v3752_v19 = vadd.f32 %v3031_v17, %v4644_v30  ;;  %v3033_v29 = vpop.f32.mrb[33].mxu0  ;;  %v3074_v28 = vpop.f32.mrb[33].mxu1  ;;  %v3754_v56 = vadd.f32 %v3072_v26, %v4652_v48 }
 0x8c1   :  { %v3753_v51 = vadd.f32 %v3033_v29, %v4646_v31  ;;  %v3035_v33 = vpop.f32.mrb[34].mxu0  ;;  %v3076_v32 = vpop.f32.mrb[34].mxu1  ;;  %v3755_v21 = vadd.f32 %v3074_v28, %v4654_v50 }
 0x8c2   :  { %v3608_v20 = vmul.f32 -1.442695, %v3752_v19  ;;  %v3036_v34 = vpop.f32.mrb[35].mxu0  ;;  %v3077_v27 = vpop.f32.mrb[35].mxu1  ;;  %v3614_v33 = vld [vmem:[%s5005_s7] ss:$0 sm:$0xff] }
 0x8c3   :  { %v3609_v36 = vmul.f32 -1.442695, %v3753_v51  ;;  %v3610_v55 = vmul.f32 -1.442695, %v3755_v21  ;;  %s4137_s7 = smov [#allocation5]  }
 0x8c4   :  { %4031 = vpow2.f32 %v3608_v20  ;;  %s3354_s11 = sshll.u32 %s4137_s7, 4  ;;  %s3355_s11 = int_to_ptr.vmem [resolvable:$true] %s3354_s11 }
 0x8c5   :  { %4033 = vpow2.f32 %v3609_v36  ;;  %s4104_s12 = scalar_lea.vmem %s3355_s11, 32  ;;  %p4109_p9 = scmp.lt.s32.totalorder %s3355_s11, %s3355_s11 }
 0x8c6   :  { %4035 = vpow2.f32 %v3610_v55  ;;  %p4105_p8 = scmp.ne.s32.totalorder %s3355_s11, %s4104_s12  ;;  %p4110_p10 = scmp.lt.s32.totalorder %s4104_s12, %s4104_s12 }
 0x8c7   :  { %4037 = vtanh.f32 %v3754_v56 }
 0x8c8   :  { %p4111_p11 = por %p4110_p10, %p4109_p9 }
 0x8ca   :  { %p4112_p12 = pnand %p4111_p11, %p4105_p8 }
 0x8ce   :  { %v4032_v57 = vpop.eup %4031 }
 0x8cf   :  { %v4034_v58 = vpop.eup %4033  ;;  %v3086_v18 = vadd.f32 1.0, %v4032_v57 }
 0x8d0   :  { %v3092_v59 = vadd.f32 1.0, %v4034_v58  ;;  %v4036_v60 = vpop.eup %4035 }
 0x8d1   :  { %4039 = vrcp.f32 %v3086_v18  ;;  %v4038_v61 = vpop.eup %4037  ;;  %v3099_v1 = vadd.f32 1.0, %v4036_v60 }
 0x8d2   :  { %4041 = vrcp.f32 %v3092_v59 }
 0x8d3   :  { %4043 = vrcp.f32 %v3099_v1 }
 0x8db   :  { %v4040_v62 = vpop.eup %4039 }
 0x8dc   :  { %v4042_v63 = vpop.eup %4041  ;;  %v3103_v0 = vmul.f32 %v4040_v62, %v4038_v61 }
 0x8dd   :  { %v3102_v54 = vmul.f32 %v4042_v63, %v4868_v47  ;;  %v4044_v3 = vpop.eup %4043 }
 0x8df   :  { %v4939_v2 = vadd.f32 %v3103_v0, %v3102_v54 }
 0x8e1   :  { %4045 = vtanh.f32 %v4939_v2 }
 0x8eb   :  { %v4046_v4 = vpop.eup %4045 }
 0x8ec   :  { %v3106_v5 = vmul.f32 %v4046_v4, %v4044_v3 }
 0x8ee   :  { %v3111_v25 = vpack.c.bf16 %v3106_v5, %v3106_v5 }
 0x8f0   :  { %3145 = vmatmul.mubr.bf16.vlgmr.msra.gmra.mrb[36].mxu0 %v3111_v25  ;;  %3186 = vmatmul.mubr.bf16.vlgmr.msra.gmra.mrb[36].mxu1 %v3111_v25 }
 0x8f1   :  { %3722 = vmatprep.mubr.msk.bf16.mxu0 %vm4135_vm0, %v4134_v45  ;;  %3707 = vmatpush3.bf16.msra.mxu0 %v3927_v37 }
 0x8f2   :  { %3708 = vmatprep.subr.bf16.mxu0 %v4134_v45 }
 0x8f5   :  { %3709 = vmatpush3.bf16.msra.mxu0 %v3928_v38 }
 0x8f6   :  { %3710 = vmatprep.subr.bf16.mxu0 %v4134_v45 }
 0x8f9   :  { %3711 = vmatpush3.bf16.msra.mxu0 %v3929_v39 }
 0x8fa   :  { %3712 = vmatprep.subr.bf16.mxu0 %v4134_v45 }
 0x8fd   :  { %3713 = vmatpush3.bf16.msra.mxu0 %v3930_v40 }
 0x8fe   :  { %3714 = vmatprep.subr.bf16.mxu0 %v4134_v45 }
 0x901   :  { %3715 = vmatpush3.bf16.msra.mxu0 %v3931_v41 }
 0x902   :  { %3716 = vmatprep.subr.bf16.mxu0 %v4134_v45 }
 0x905   :  { %3717 = vmatpush3.bf16.msra.mxu0 %v3932_v42 }
 0x906   :  { %3718 = vmatprep.subr.bf16.mxu0 %v4134_v45 }
 0x909   :  { %3719 = vmatpush3.bf16.msra.mxu0 %v3933_v44 }
 0x90a   :  { %3720 = vmatprep.subr.bf16.mxu0 %v4134_v45 }
 0x90d   :  { %3721 = vmatpush3.bf16.msra.mxu0 %v3934_v46 }
 0x9c3   :  { %v3146_v47 = vpop.f32.mrb[36].mxu0  ;;  %v3187_v35 = vpop.f32.mrb[36].mxu1 }
 0x9c4   :  { %v3756_v49 = vadd.f32 %v3146_v47, %v4644_v30  ;;  %v3148_v53 = vpop.f32.mrb[37].mxu0  ;;  %v3189_v22 = vpop.f32.mrb[37].mxu1  ;;  %v3758_v10 = vadd.f32 %v3187_v35, %v4652_v48 }
 0x9c5   :  { %v3757_v23 = vadd.f32 %v3148_v53, %v4646_v31  ;;  %v3150_v43 = vpop.f32.mrb[38].mxu0  ;;  %v3191_v24 = vpop.f32.mrb[38].mxu1  ;;  %v3759_v9 = vadd.f32 %v3189_v22, %v4654_v50 }
 0x9c6   :  { %v3611_v6 = vmul.f32 -1.442695, %v3756_v49  ;;  %v3151_v7 = vpop.f32.mrb[39].mxu0  ;;  %v3192_v52 = vpop.f32.mrb[39].mxu1 }
 0x9c7   :  { %v3612_v8 = vmul.f32 -1.442695, %v3757_v23  ;;  %v3613_v45 = vmul.f32 -1.442695, %v3759_v9 }
 0x9c8   :  { %4047 = vpow2.f32 %v3611_v6 }
 0x9c9   :  { %4049 = vpow2.f32 %v3612_v8 }
 0x9ca   :  { %4051 = vpow2.f32 %v3613_v45 }
 0x9cb   :  { %4053 = vtanh.f32 %v3758_v10 }
 0x9d2   :  { %v4048_v11 = vpop.eup %4047 }
 0x9d3   :  { %v4050_v12 = vpop.eup %4049  ;;  %v3201_v30 = vadd.f32 1.0, %v4048_v11 }
 0x9d4   :  { %v3207_v13 = vadd.f32 1.0, %v4050_v12  ;;  %v4052_v31 = vpop.eup %4051 }
 0x9d5   :  { %4055 = vrcp.f32 %v3201_v30  ;;  %v4054_v14 = vpop.eup %4053  ;;  %v3214_v26 = vadd.f32 1.0, %v4052_v31 }
 0x9d6   :  { %4057 = vrcp.f32 %v3207_v13 }
 0x9d7   :  { %4059 = vrcp.f32 %v3214_v26 }
 0x9df   :  { %v4056_v15 = vpop.eup %4055 }
 0x9e0   :  { %v4058_v16 = vpop.eup %4057  ;;  %v3218_v17 = vmul.f32 %v4056_v15, %v4054_v14 }
 0x9e1   :  { %v3217_v19 = vmul.f32 %v4058_v16, %v4939_v2  ;;  %v4060_v48 = vpop.eup %4059 }
 0x9e3   :  { %v3219_v50 = vadd.f32 %v3218_v17, %v3217_v19 }
 0x9e5   :  { %4061 = vtanh.f32 %v3219_v50 }
 0x9ef   :  { %v4062_v29 = vpop.eup %4061 }
 0x9f0   :  { %v3221_v28 = vmul.f32 %v4062_v29, %v4060_v48 }
 0x9f2   :  { %v3222_v51 = vpack.c.bf16 %v3221_v28, %v3221_v28 }
 0x9f4   :  { %3723 = vmatmul.mubr.bf16.vlgmr.msra.gmra.mrb[40].mxu0 %v3222_v51 }
 0xac7   :  { %v3328_v32 = vpop.f32.mrb[40].mxu0 }
 0xac8   :  { %v3329_v20 = vadd.f32 %v3614_v33, %v3328_v32  ;;  %v3724_v34 = vpop.f32.mrb[41].mxu0 }
 0xac9   :  { %v3331_v27 = vpop.f32.mrb[42].mxu0 }
 0xaca   :  { %v3725_v36 = vpop.f32.mrb[43].mxu0  ;;  %v3335_v21 = vsel %vm3334_vm3, %v3329_v20, -inf }
 0xacb   :  { %3336 = vmax.xlane.f32.xlu0 %v3335_v21 }
 0xb58   :  { %v3337_v55 = vpop.xlane.xlu0 %3336 }
 0xb59   :  { %v3338_v56 = vsub.f32 %v3329_v20, %v3337_v55 }
 0xb5b   :  { %v3339_v57 = vmul.f32 1.442695, %v3338_v56 }
 0xb5d   :  { %4063 = vpow2.f32 %v3339_v57 }
 0xb67   :  { %v4064_v58 = vpop.eup %4063 }
 0xb68   :  { %v3341_v18 = vsel %vm3334_vm3, %v4064_v58, 0.0 }
 0xb69   :  { %3342 = vadd.xlane.f32.xlu0 %v3341_v18 }
 0xbf6   :  { %v3343_v59 = vpop.xlane.xlu0 %3342 }
 0xbf7   :  { %4065 = vlog2.f32 %v3343_v59 }
 0xc01   :  { %v4066_v60 = vpop.eup %4065 }
 0xc02   :  { %v3345_v61 = vmul.f32 0.6931472, %v4066_v60 }
 0xc04   :  { %v3346_v62 = vsub.f32 %v3338_v56, %v3345_v61 }
 0xc06   :  { %3347 = vst.msk [vmem:[#allocation5] sm:$0x3] %vm3334_vm3, %v3346_v62 }
 0xc07   :  { %4115 = shalt.err (!%p4112_p12)
}
 0xc08   :  { %s4116_s15 = scalar_lea.hbm %s5006_s8, 32 }
 0xc09   :  { %p4117_p13 = scmp.ne.s32.totalorder %s5006_s8, %s4116_s15  ;;  %p4120_p0 = scmp.lt.u32.totalorder %s4116_s15, %s5006_s8 }
 0xc0b   :  { %p4122_p1 = pnand %p4120_p0, %p4117_p13 }
 0xc0d   :  { %4125 = shalt.err (!%p4122_p1)
}
 0xc0e   :  { %3357 = dma.vmem_to_hbm [thread:$0]  %s3355_s11, 32, %s5006_s8, [#allocation4]  }
 0xc0f   :  { %4128 = dma.done.wait [#allocation4], 32  }
 0xc10   :  { %4129 = vsyncadd [#allocation4], 4294967264 }
 0xc11   :  { %3361 = vsyncpa [#allocation3], 1 }
 0xc12   :  { %3362 = vsyncpa [#allocation4], 1 }

</bundles_post_ra>
